<compile_context>
chip_gen: v7x
topology: tpu7x:2x2x1
jax: 0.10.0
libtpu: 0.0.40
codegen_flags: <defaults>
</compile_context>

<pallas_src>
import jax
import jax.numpy as jnp
from jax.experimental import pallas as pl
from jax.experimental.pallas import tpu as pltpu

NUM_PASSIVE = 2          # fc1top is Linear(128*2, 20) -> 2 passive parties
IN_FEATS = 14 * 28       # 392
H1, H2 = 256, 128
AGG = H2 * NUM_PASSIVE   # 256
TOP1 = 20                # fc1top output width
NCLS = 10                # logits
LANE = 128               # lane-dense padded width for the top stack / output
EPS = 1e-5

_VMEM = pltpu.MemorySpace.VMEM


def _fc1_kernel(x_ref, w1_ref, b1_ref, w2_ref, b2_ref,
                bn0g_ref, bn0b_ref, f1w_ref, f1b_ref,
                bn1g_ref, bn1b_ref, f2w_ref, f2b_ref,
                bn2g_ref, bn2b_ref, f3w_ref, f3b_ref,
                bn3g_ref, bn3b_ref, f4w_ref, f4b_ref,
                out_ref, acc_ref):
    p = pl.program_id(0)
    batch = x_ref.shape[1]
    inv_b = 1.0 / batch                       # static -> folded at trace time

    @pl.when(p == 0)
    def _init():
        acc_ref[...] = jnp.zeros_like(acc_ref)

    # ---- bottom MLPNet for this party: Linear 392->256, ReLU, Linear 256->128 --------
    x = x_ref[0]                                                   # (B, 392) bf16
    h = jnp.dot(x, w1_ref[0], preferred_element_type=jnp.float32) + b1_ref[0]
    h = jnp.maximum(h, 0.0)
    e = jnp.dot(h.astype(jnp.bfloat16), w2_ref[0],
                preferred_element_type=jnp.float32) + b2_ref[0]    # (B, 128) f32

    # ---- BN0 (train mode, whole-batch stats) + ReLU on this party's 128-wide slice ---
    mean = jnp.sum(e, axis=0, keepdims=True) * inv_b
    var = jnp.sum(e * e, axis=0, keepdims=True) * inv_b - mean * mean
    a = jnp.maximum((e - mean) * jax.lax.rsqrt(var + EPS) * bn0g_ref[0] + bn0b_ref[0],
                    0.0)

    # ---- concat-free fc1top: accumulate this party's contribution on the MXU ---------
    acc_ref[...] += jnp.dot(a.astype(jnp.bfloat16), f1w_ref[0],
                            preferred_element_type=jnp.float32)    # (B, 128)

    # ---- last party: finish the (lane-padded) top model, full unmasked store ---------
    @pl.when(p == pl.num_programs(0) - 1)
    def _finish():
        def bn_relu(t, g_ref, b_ref):
            m = jnp.sum(t, axis=0, keepdims=True) * inv_b
            v = jnp.sum(t * t, axis=0, keepdims=True) * inv_b - m * m
            tn = (t - m) * jax.lax.rsqrt(v + EPS)
            return jnp.maximum(tn * g_ref[...] + b_ref[...], 0.0)

        def lin(t, w_ref, b_ref):
            return jnp.dot(t.astype(w_ref.dtype), w_ref[...],
                           preferred_element_type=jnp.float32) + b_ref[...]

        z = acc_ref[...] + f1b_ref[...]                               # (B, 128)
        z = lin(bn_relu(z, bn1g_ref, bn1b_ref), f2w_ref, f2b_ref)     # (B, 128)
        z = lin(bn_relu(z, bn2g_ref, bn2b_ref), f3w_ref, f3b_ref)     # (B, 128)
        z = lin(bn_relu(z, bn3g_ref, bn3b_ref), f4w_ref, f4b_ref)     # (B, 128)
        out_ref[...] = z                                              # lane-dense store


def _party_spec(shape):
    """Per-party 3-D operand: block p along the leading (party) grid axis."""
    return pl.BlockSpec((1,) + shape, lambda p: (p, 0, 0), memory_space=_VMEM)


def _shared_spec(shape):
    """Grid-invariant operand: constant index_map -> fetched once, stays VMEM-resident."""
    nd = len(shape)
    return pl.BlockSpec(shape, lambda p: (0,) * nd, memory_space=_VMEM)


def fc1_forward(data_list, params):
    """data_list: NUM_PASSIVE arrays, each (B, 1, 14, 28). Returns (B, 10) f32 logits."""
    assert len(data_list) == NUM_PASSIVE
    B = data_list[0].shape[0]
    (w1, b1, w2, b2,
     bn0g, bn0b, bn1g, bn1b, bn2g, bn2b, bn3g, bn3b,
     f1w, f1b, f2w, f2b, f3w, f3b, f4w, f4b) = params

    # bf16 operands for all matmuls (f32 accumulation happens inside the kernel).
    x = jnp.stack([d.reshape(B, IN_FEATS) for d in data_list]).astype(jnp.bfloat16)
    w1_bf = w1.astype(jnp.bfloat16)                       # (P, 392, 256)
    w2_bf = w2.astype(jnp.bfloat16)                       # (P, 256, 128)

    # Concat-free fc1top + per-party BN0 slices (BatchNorm1d is per-feature, so slicing
    # gamma/beta/weight rows along the 256-wide concat axis is exact).
    pad_c = lambda a: jnp.pad(a, ((0, 0), (0, LANE - a.shape[1])))
    pad_rc = lambda a: jnp.pad(a, ((0, LANE - a.shape[0]), (0, LANE - a.shape[1])))

    f1w_p = pad_c(f1w).reshape(NUM_PASSIVE, H2, LANE).astype(jnp.bfloat16)  # (P,128,128)
    bn0g_p = bn0g.reshape(NUM_PASSIVE, 1, H2)
    bn0b_p = bn0b.reshape(NUM_PASSIVE, 1, H2)

    # Lane-pad the tiny top-model params to width 128: padded columns/rows are zero, so
    # the extra lanes carry exact zeros end-to-end and never perturb the real logits.
    f1b_p = pad_c(f1b)
    bn1g_p, bn1b_p = pad_c(bn1g), pad_c(bn1b)
    f2w_p, f2b_p = pad_rc(f2w).astype(jnp.bfloat16), pad_c(f2b)
    bn2g_p, bn2b_p = pad_c(bn2g), pad_c(bn2b)
    f3w_p, f3b_p = pad_rc(f3w).astype(jnp.bfloat16), pad_c(f3b)
    bn3g_p, bn3b_p = pad_c(bn3g), pad_c(bn3b)
    f4w_p, f4b_p = pad_rc(f4w).astype(jnp.bfloat16), pad_c(f4b)

    out_padded = pl.pallas_call(
        _fc1_kernel,
        out_shape=jax.ShapeDtypeStruct((B, LANE), jnp.float32),
        grid_spec=pltpu.PrefetchScalarGridSpec(
            num_scalar_prefetch=0,
            grid=(NUM_PASSIVE,),
            in_specs=[
                _party_spec((B, IN_FEATS)),      # x           (bf16)
                _party_spec((IN_FEATS, H1)),     # w1          (bf16)
                _party_spec((1, H1)),            # b1          (f32)
                _party_spec((H1, H2)),           # w2          (bf16)
                _party_spec((1, H2)),            # b2          (f32)
                _party_spec((1, H2)),            # bn0 gamma slice
                _party_spec((1, H2)),            # bn0 beta slice
                _party_spec((H2, LANE)),         # fc1top weight slice (bf16)
                _shared_spec((1, LANE)),         # fc1top bias
                _shared_spec((1, LANE)),         # bn1 gamma
                _shared_spec((1, LANE)),         # bn1 beta
                _shared_spec((LANE, LANE)),      # fc2top weight (bf16)
                _shared_spec((1, LANE)),         # fc2top bias
                _shared_spec((1, LANE)),         # bn2 gamma
                _shared_spec((1, LANE)),         # bn2 beta
                _shared_spec((LANE, LANE)),      # fc3top weight (bf16)
                _shared_spec((1, LANE)),         # fc3top bias
                _shared_spec((1, LANE)),         # bn3 gamma
                _shared_spec((1, LANE)),         # bn3 beta
                _shared_spec((LANE, LANE)),      # fc4top weight (bf16)
                _shared_spec((1, LANE)),         # fc4top bias
            ],
            out_specs=_shared_spec((B, LANE)),
            scratch_shapes=[pltpu.VMEM((B, LANE), jnp.float32)],   # fc1top accumulator
        ),
        compiler_params=pltpu.CompilerParams(
            dimension_semantics=("arbitrary",),   # party axis reduces into acc_ref
        ),
    )(x, w1_bf, b1, w2_bf, b2, bn0g_p, bn0b_p, f1w_p, f1b_p,
      bn1g_p, bn1b_p, f2w_p, f2b_p, bn2g_p, bn2b_p, f3w_p, f3b_p,
      bn3g_p, bn3b_p, f4w_p, f4b_p)

    return out_padded[:, :NCLS]


def init_params(key):
    """Deterministic synthetic parameters mirroring the PyTorch shapes / init styles."""
    ks = iter(jax.random.split(key, 64))

    def xavier(in_f, out_f):
        std = (2.0 / (in_f + out_f)) ** 0.5
        return jax.random.normal(next(ks), (in_f, out_f), jnp.float32) * std

    def nrm(shape, mean=0.0, std=1.0):
        return jax.random.normal(next(ks), shape, jnp.float32) * std + mean

    # Bottom MLPNets (stacked over passive parties).
    w1 = jnp.stack([xavier(IN_FEATS, H1) for _ in range(NUM_PASSIVE)])    # (P, 392, 256)
    b1 = jnp.stack([nrm((1, H1), std=0.02) for _ in range(NUM_PASSIVE)])  # (P, 1, 256)
    w2 = jnp.stack([xavier(H1, H2) for _ in range(NUM_PASSIVE)])          # (P, 256, 128)
    b2 = jnp.stack([nrm((1, H2), std=0.02) for _ in range(NUM_PASSIVE)])  # (P, 1, 128)

    # Top model: BN gamma ~ N(1, 0.02), beta = 0 (per weights_init); Linear xavier + N(0,1) bias.
    bn = []
    for n in (AGG, TOP1, NCLS, NCLS):
        bn.append(nrm((1, n), mean=1.0, std=0.02))      # gamma
        bn.append(jnp.zeros((1, n), jnp.float32))       # beta
    fcs = []
    for fi, fo in ((AGG, TOP1), (TOP1, NCLS), (NCLS, NCLS), (NCLS, NCLS)):
        fcs.append(xavier(fi, fo))
        fcs.append(nrm((1, fo)))
    return (w1, b1, w2, b2, *bn, *fcs)


if __name__ == "__main__":
    key = jax.random.PRNGKey(0)
    k_data, k_param = jax.random.split(key)

    B = 2
    data = [
        jax.random.normal(jax.random.fold_in(k_data, i), (B, 1, 14, 28), jnp.float32)
        for i in range(NUM_PASSIVE)
    ]
    params = init_params(k_param)

    logits = fc1_forward(data, params)
    jax.block_until_ready(logits)
    assert logits.shape == (B, NCLS) and logits.dtype == jnp.float32
    print("KERNEL_OK")
</pallas_src>

<mosaic_0001>
module attributes {stable_mosaic.version = 11 : i64} {
  func.func @_fc1_kernel(%arg0: i32, %arg1: memref<1x2x392xbf16, #tpu.memory_space<vmem>>, %arg2: memref<1x392x256xbf16, #tpu.memory_space<vmem>>, %arg3: memref<1x1x256xf32, #tpu.memory_space<vmem>>, %arg4: memref<1x256x128xbf16, #tpu.memory_space<vmem>>, %arg5: memref<1x1x128xf32, #tpu.memory_space<vmem>>, %arg6: memref<1x1x128xf32, #tpu.memory_space<vmem>>, %arg7: memref<1x1x128xf32, #tpu.memory_space<vmem>>, %arg8: memref<1x128x128xbf16, #tpu.memory_space<vmem>>, %arg9: memref<1x128xf32, #tpu.memory_space<vmem>>, %arg10: memref<1x128xf32, #tpu.memory_space<vmem>>, %arg11: memref<1x128xf32, #tpu.memory_space<vmem>>, %arg12: memref<128x128xbf16, #tpu.memory_space<vmem>>, %arg13: memref<1x128xf32, #tpu.memory_space<vmem>>, %arg14: memref<1x128xf32, #tpu.memory_space<vmem>>, %arg15: memref<1x128xf32, #tpu.memory_space<vmem>>, %arg16: memref<128x128xbf16, #tpu.memory_space<vmem>>, %arg17: memref<1x128xf32, #tpu.memory_space<vmem>>, %arg18: memref<1x128xf32, #tpu.memory_space<vmem>>, %arg19: memref<1x128xf32, #tpu.memory_space<vmem>>, %arg20: memref<128x128xbf16, #tpu.memory_space<vmem>>, %arg21: memref<1x128xf32, #tpu.memory_space<vmem>>, %arg22: memref<2x128xf32, #tpu.memory_space<vmem>>, %arg23: memref<2x128xf32, #tpu.memory_space<vmem>>) attributes {dimension_semantics = [#tpu.dimension_semantics<arbitrary>], iteration_bounds = array<i64: 2>, scalar_prefetch = 0 : i64, scratch_operands = 1 : i64, tpu.core_type = #tpu.core_type<tc>, window_params = [{transform_indices = @transform_0, window_bounds = array<i64: 1, 2, 392>}, {transform_indices = @transform_1, window_bounds = array<i64: 1, 392, 256>}, {transform_indices = @transform_2, window_bounds = array<i64: 1, 1, 256>}, {transform_indices = @transform_3, window_bounds = array<i64: 1, 256, 128>}, {transform_indices = @transform_4, window_bounds = array<i64: 1, 1, 128>}, {transform_indices = @transform_5, window_bounds = array<i64: 1, 1, 128>}, {transform_indices = @transform_6, window_bounds = array<i64: 1, 1, 128>}, {transform_indices = @transform_7, window_bounds = array<i64: 1, 128, 128>}, {pipeline_mode = #tpu.pipeline_mode<synchronous>, transform_indices = @transform_8, window_bounds = array<i64: 1, 128>}, {pipeline_mode = #tpu.pipeline_mode<synchronous>, transform_indices = @transform_9, window_bounds = array<i64: 1, 128>}, {pipeline_mode = #tpu.pipeline_mode<synchronous>, transform_indices = @transform_10, window_bounds = array<i64: 1, 128>}, {pipeline_mode = #tpu.pipeline_mode<synchronous>, transform_indices = @transform_11, window_bounds = array<i64: 128, 128>}, {pipeline_mode = #tpu.pipeline_mode<synchronous>, transform_indices = @transform_12, window_bounds = array<i64: 1, 128>}, {pipeline_mode = #tpu.pipeline_mode<synchronous>, transform_indices = @transform_13, window_bounds = array<i64: 1, 128>}, {pipeline_mode = #tpu.pipeline_mode<synchronous>, transform_indices = @transform_14, window_bounds = array<i64: 1, 128>}, {pipeline_mode = #tpu.pipeline_mode<synchronous>, transform_indices = @transform_15, window_bounds = array<i64: 128, 128>}, {pipeline_mode = #tpu.pipeline_mode<synchronous>, transform_indices = @transform_16, window_bounds = array<i64: 1, 128>}, {pipeline_mode = #tpu.pipeline_mode<synchronous>, transform_indices = @transform_17, window_bounds = array<i64: 1, 128>}, {pipeline_mode = #tpu.pipeline_mode<synchronous>, transform_indices = @transform_18, window_bounds = array<i64: 1, 128>}, {pipeline_mode = #tpu.pipeline_mode<synchronous>, transform_indices = @transform_19, window_bounds = array<i64: 128, 128>}, {pipeline_mode = #tpu.pipeline_mode<synchronous>, transform_indices = @transform_20, window_bounds = array<i64: 1, 128>}, {pipeline_mode = #tpu.pipeline_mode<synchronous>, transform_indices = @transform_21, window_bounds = array<i64: 2, 128>}]} {
    %c0_i32 = arith.constant 0 : i32
    %0 = arith.cmpi eq, %arg0, %c0_i32 : i32
    %1 = arith.extui %0 : i1 to i32
    %c0_i32_0 = arith.constant 0 : i32
    %2 = arith.cmpi ne, %1, %c0_i32_0 : i32
    scf.if %2 {
      %cst_38 = arith.constant 0.000000e+00 : f32
      %60 = vector.broadcast %cst_38 : f32 to vector<2x128xf32>
      %c0_39 = arith.constant 0 : index
      %c0_40 = arith.constant 0 : index
      %61 = vector.load %arg23[%c0_39, %c0_40] : memref<2x128xf32, #tpu.memory_space<vmem>>, vector<2x128xf32>
      tpu.vector_store %arg23[%c0_39, %c0_40], %60 {strides = array<i32>} : memref<2x128xf32, #tpu.memory_space<vmem>>, vector<2x128xf32>,
    } else {
    }
    %c0 = arith.constant 0 : index
    %c0_1 = arith.constant 0 : index
    %c0_2 = arith.constant 0 : index
    %3 = vector.load %arg1[%c0, %c0_1, %c0_2] : memref<1x2x392xbf16, #tpu.memory_space<vmem>>, vector<1x2x392xbf16>
    %4 = vector.shape_cast %3 : vector<1x2x392xbf16> to vector<2x392xbf16>
    %c0_3 = arith.constant 0 : index
    %c0_4 = arith.constant 0 : index
    %c0_5 = arith.constant 0 : index
    %5 = vector.load %arg2[%c0_3, %c0_4, %c0_5] : memref<1x392x256xbf16, #tpu.memory_space<vmem>>, vector<1x392x256xbf16>
    %6 = vector.shape_cast %5 : vector<1x392x256xbf16> to vector<392x256xbf16>
    %cst = arith.constant dense<0.000000e+00> : vector<2x256xf32>
    %7 = tpu.matmul %4, %6, %cst {dimension_numbers = #tpu.dot_dimension_numbers<[1], [0], [0], [1], [0, 0, 1, 1], [], []>} : vector<2x392xbf16>, vector<392x256xbf16>, vector<2x256xf32> -> vector<2x256xf32>
    %c0_6 = arith.constant 0 : index
    %c0_7 = arith.constant 0 : index
    %c0_8 = arith.constant 0 : index
    %8 = vector.load %arg3[%c0_6, %c0_7, %c0_8] : memref<1x1x256xf32, #tpu.memory_space<vmem>>, vector<1x1x256xf32>
    %9 = vector.shape_cast %8 : vector<1x1x256xf32> to vector<1x256xf32>
    %10 = vector.broadcast %9 : vector<1x256xf32> to vector<2x256xf32>
    %11 = arith.addf %7, %10 : vector<2x256xf32>
    %cst_9 = arith.constant 0.000000e+00 : f32
    %12 = vector.broadcast %cst_9 : f32 to vector<2x256xf32>
    %13 = arith.maximumf %11, %12 : vector<2x256xf32>
    %14 = arith.truncf %13 : vector<2x256xf32> to vector<2x256xbf16>
    %c0_10 = arith.constant 0 : index
    %c0_11 = arith.constant 0 : index
    %c0_12 = arith.constant 0 : index
    %15 = vector.load %arg4[%c0_10, %c0_11, %c0_12] : memref<1x256x128xbf16, #tpu.memory_space<vmem>>, vector<1x256x128xbf16>
    %16 = vector.shape_cast %15 : vector<1x256x128xbf16> to vector<256x128xbf16>
    %cst_13 = arith.constant dense<0.000000e+00> : vector<2x128xf32>
    %17 = tpu.matmul %14, %16, %cst_13 {dimension_numbers = #tpu.dot_dimension_numbers<[1], [0], [0], [1], [0, 0, 1, 1], [], []>} : vector<2x256xbf16>, vector<256x128xbf16>, vector<2x128xf32> -> vector<2x128xf32>
    %c0_14 = arith.constant 0 : index
    %c0_15 = arith.constant 0 : index
    %c0_16 = arith.constant 0 : index
    %18 = vector.load %arg5[%c0_14, %c0_15, %c0_16] : memref<1x1x128xf32, #tpu.memory_space<vmem>>, vector<1x1x128xf32>
    %19 = vector.shape_cast %18 : vector<1x1x128xf32> to vector<1x128xf32>
    %20 = vector.broadcast %19 : vector<1x128xf32> to vector<2x128xf32>
    %21 = arith.addf %17, %20 : vector<2x128xf32>
    %cst_17 = arith.constant dense<0.000000e+00> : vector<128xf32>
    %22 = vector.multi_reduction <add>, %21, %cst_17 [0] : vector<2x128xf32> to vector<128xf32>
    %23 = vector.shape_cast %22 : vector<128xf32> to vector<1x128xf32>
    %cst_18 = arith.constant 5.000000e-01 : f32
    %24 = vector.broadcast %cst_18 : f32 to vector<1x128xf32>
    %25 = arith.mulf %23, %24 : vector<1x128xf32>
    %26 = arith.mulf %21, %21 : vector<2x128xf32>
    %cst_19 = arith.constant dense<0.000000e+00> : vector<128xf32>
    %27 = vector.multi_reduction <add>, %26, %cst_19 [0] : vector<2x128xf32> to vector<128xf32>
    %28 = vector.shape_cast %27 : vector<128xf32> to vector<1x128xf32>
    %cst_20 = arith.constant 5.000000e-01 : f32
    %29 = vector.broadcast %cst_20 : f32 to vector<1x128xf32>
    %30 = arith.mulf %28, %29 : vector<1x128xf32>
    %31 = arith.mulf %25, %25 : vector<1x128xf32>
    %32 = arith.subf %30, %31 : vector<1x128xf32>
    %33 = vector.broadcast %25 : vector<1x128xf32> to vector<2x128xf32>
    %34 = arith.subf %21, %33 : vector<2x128xf32>
    %cst_21 = arith.constant 9.99999974E-6 : f32
    %35 = vector.broadcast %cst_21 : f32 to vector<1x128xf32>
    %36 = arith.addf %32, %35 : vector<1x128xf32>
    %37 = math.rsqrt %36 : vector<1x128xf32>
    %38 = vector.broadcast %37 : vector<1x128xf32> to vector<2x128xf32>
    %39 = arith.mulf %34, %38 : vector<2x128xf32>
    %c0_22 = arith.constant 0 : index
    %c0_23 = arith.constant 0 : index
    %c0_24 = arith.constant 0 : index
    %40 = vector.load %arg6[%c0_22, %c0_23, %c0_24] : memref<1x1x128xf32, #tpu.memory_space<vmem>>, vector<1x1x128xf32>
    %41 = vector.shape_cast %40 : vector<1x1x128xf32> to vector<1x128xf32>
    %42 = vector.broadcast %41 : vector<1x128xf32> to vector<2x128xf32>
    %43 = arith.mulf %39, %42 : vector<2x128xf32>
    %c0_25 = arith.constant 0 : index
    %c0_26 = arith.constant 0 : index
    %c0_27 = arith.constant 0 : index
    %44 = vector.load %arg7[%c0_25, %c0_26, %c0_27] : memref<1x1x128xf32, #tpu.memory_space<vmem>>, vector<1x1x128xf32>
    %45 = vector.shape_cast %44 : vector<1x1x128xf32> to vector<1x128xf32>
    %46 = vector.broadcast %45 : vector<1x128xf32> to vector<2x128xf32>
    %47 = arith.addf %43, %46 : vector<2x128xf32>
    %cst_28 = arith.constant 0.000000e+00 : f32
    %48 = vector.broadcast %cst_28 : f32 to vector<2x128xf32>
    %49 = arith.maximumf %47, %48 : vector<2x128xf32>
    %c0_29 = arith.constant 0 : index
    %c0_30 = arith.constant 0 : index
    %50 = vector.load %arg23[%c0_29, %c0_30] : memref<2x128xf32, #tpu.memory_space<vmem>>, vector<2x128xf32>
    %51 = arith.truncf %49 : vector<2x128xf32> to vector<2x128xbf16>
    %c0_31 = arith.constant 0 : index
    %c0_32 = arith.constant 0 : index
    %c0_33 = arith.constant 0 : index
    %52 = vector.load %arg8[%c0_31, %c0_32, %c0_33] : memref<1x128x128xbf16, #tpu.memory_space<vmem>>, vector<1x128x128xbf16>
    %53 = vector.shape_cast %52 : vector<1x128x128xbf16> to vector<128x128xbf16>
    %cst_34 = arith.constant dense<0.000000e+00> : vector<2x128xf32>
    %54 = tpu.matmul %51, %53, %cst_34 {dimension_numbers = #tpu.dot_dimension_numbers<[1], [0], [0], [1], [0, 0, 1, 1], [], []>} : vector<2x128xbf16>, vector<128x128xbf16>, vector<2x128xf32> -> vector<2x128xf32>
    %55 = arith.addf %50, %54 : vector<2x128xf32>
    %c0_35 = arith.constant 0 : index
    %c0_36 = arith.constant 0 : index
    %56 = vector.load %arg23[%c0_35, %c0_36] : memref<2x128xf32, #tpu.memory_space<vmem>>, vector<2x128xf32>
    tpu.vector_store %arg23[%c0_35, %c0_36], %55 {strides = array<i32>} : memref<2x128xf32, #tpu.memory_space<vmem>>, vector<2x128xf32>,
    %c1_i32 = arith.constant 1 : i32
    %57 = arith.cmpi eq, %arg0, %c1_i32 : i32
    %58 = arith.extui %57 : i1 to i32
    %c0_i32_37 = arith.constant 0 : i32
    %59 = arith.cmpi ne, %58, %c0_i32_37 : i32
    scf.if %59 {
      %c0_38 = arith.constant 0 : index
      %c0_39 = arith.constant 0 : index
      %60 = vector.load %arg23[%c0_38, %c0_39] : memref<2x128xf32, #tpu.memory_space<vmem>>, vector<2x128xf32>
      %c0_40 = arith.constant 0 : index
      %c0_41 = arith.constant 0 : index
      %61 = vector.load %arg9[%c0_40, %c0_41] : memref<1x128xf32, #tpu.memory_space<vmem>>, vector<1x128xf32>
      %62 = vector.broadcast %61 : vector<1x128xf32> to vector<2x128xf32>
      %63 = arith.addf %60, %62 : vector<2x128xf32>
      %cst_42 = arith.constant dense<0.000000e+00> : vector<128xf32>
      %64 = vector.multi_reduction <add>, %63, %cst_42 [0] : vector<2x128xf32> to vector<128xf32>
      %65 = vector.shape_cast %64 : vector<128xf32> to vector<1x128xf32>
      %cst_43 = arith.constant 5.000000e-01 : f32
      %66 = vector.broadcast %cst_43 : f32 to vector<1x128xf32>
      %67 = arith.mulf %65, %66 : vector<1x128xf32>
      %68 = arith.mulf %63, %63 : vector<2x128xf32>
      %cst_44 = arith.constant dense<0.000000e+00> : vector<128xf32>
      %69 = vector.multi_reduction <add>, %68, %cst_44 [0] : vector<2x128xf32> to vector<128xf32>
      %70 = vector.shape_cast %69 : vector<128xf32> to vector<1x128xf32>
      %cst_45 = arith.constant 5.000000e-01 : f32
      %71 = vector.broadcast %cst_45 : f32 to vector<1x128xf32>
      %72 = arith.mulf %70, %71 : vector<1x128xf32>
      %73 = arith.mulf %67, %67 : vector<1x128xf32>
      %74 = arith.subf %72, %73 : vector<1x128xf32>
      %75 = vector.broadcast %67 : vector<1x128xf32> to vector<2x128xf32>
      %76 = arith.subf %63, %75 : vector<2x128xf32>
      %cst_46 = arith.constant 9.99999974E-6 : f32
      %77 = vector.broadcast %cst_46 : f32 to vector<1x128xf32>
      %78 = arith.addf %74, %77 : vector<1x128xf32>
      %79 = math.rsqrt %78 : vector<1x128xf32>
      %80 = vector.broadcast %79 : vector<1x128xf32> to vector<2x128xf32>
      %81 = arith.mulf %76, %80 : vector<2x128xf32>
      %c0_47 = arith.constant 0 : index
      %c0_48 = arith.constant 0 : index
      %82 = vector.load %arg10[%c0_47, %c0_48] : memref<1x128xf32, #tpu.memory_space<vmem>>, vector<1x128xf32>
      %83 = vector.broadcast %82 : vector<1x128xf32> to vector<2x128xf32>
      %84 = arith.mulf %81, %83 : vector<2x128xf32>
      %c0_49 = arith.constant 0 : index
      %c0_50 = arith.constant 0 : index
      %85 = vector.load %arg11[%c0_49, %c0_50] : memref<1x128xf32, #tpu.memory_space<vmem>>, vector<1x128xf32>
      %86 = vector.broadcast %85 : vector<1x128xf32> to vector<2x128xf32>
      %87 = arith.addf %84, %86 : vector<2x128xf32>
      %cst_51 = arith.constant 0.000000e+00 : f32
      %88 = vector.broadcast %cst_51 : f32 to vector<2x128xf32>
      %89 = arith.maximumf %87, %88 : vector<2x128xf32>
      %90 = arith.truncf %89 : vector<2x128xf32> to vector<2x128xbf16>
      %c0_52 = arith.constant 0 : index
      %c0_53 = arith.constant 0 : index
      %91 = vector.load %arg12[%c0_52, %c0_53] : memref<128x128xbf16, #tpu.memory_space<vmem>>, vector<128x128xbf16>
      %cst_54 = arith.constant dense<0.000000e+00> : vector<2x128xf32>
      %92 = tpu.matmul %90, %91, %cst_54 {dimension_numbers = #tpu.dot_dimension_numbers<[1], [0], [0], [1], [0, 0, 1, 1], [], []>} : vector<2x128xbf16>, vector<128x128xbf16>, vector<2x128xf32> -> vector<2x128xf32>
      %c0_55 = arith.constant 0 : index
      %c0_56 = arith.constant 0 : index
      %93 = vector.load %arg13[%c0_55, %c0_56] : memref<1x128xf32, #tpu.memory_space<vmem>>, vector<1x128xf32>
      %94 = vector.broadcast %93 : vector<1x128xf32> to vector<2x128xf32>
      %95 = arith.addf %92, %94 : vector<2x128xf32>
      %cst_57 = arith.constant dense<0.000000e+00> : vector<128xf32>
      %96 = vector.multi_reduction <add>, %95, %cst_57 [0] : vector<2x128xf32> to vector<128xf32>
      %97 = vector.shape_cast %96 : vector<128xf32> to vector<1x128xf32>
      %cst_58 = arith.constant 5.000000e-01 : f32
      %98 = vector.broadcast %cst_58 : f32 to vector<1x128xf32>
      %99 = arith.mulf %97, %98 : vector<1x128xf32>
      %100 = arith.mulf %95, %95 : vector<2x128xf32>
      %cst_59 = arith.constant dense<0.000000e+00> : vector<128xf32>
      %101 = vector.multi_reduction <add>, %100, %cst_59 [0] : vector<2x128xf32> to vector<128xf32>
      %102 = vector.shape_cast %101 : vector<128xf32> to vector<1x128xf32>
      %cst_60 = arith.constant 5.000000e-01 : f32
      %103 = vector.broadcast %cst_60 : f32 to vector<1x128xf32>
      %104 = arith.mulf %102, %103 : vector<1x128xf32>
      %105 = arith.mulf %99, %99 : vector<1x128xf32>
      %106 = arith.subf %104, %105 : vector<1x128xf32>
      %107 = vector.broadcast %99 : vector<1x128xf32> to vector<2x128xf32>
      %108 = arith.subf %95, %107 : vector<2x128xf32>
      %cst_61 = arith.constant 9.99999974E-6 : f32
      %109 = vector.broadcast %cst_61 : f32 to vector<1x128xf32>
      %110 = arith.addf %106, %109 : vector<1x128xf32>
      %111 = math.rsqrt %110 : vector<1x128xf32>
      %112 = vector.broadcast %111 : vector<1x128xf32> to vector<2x128xf32>
      %113 = arith.mulf %108, %112 : vector<2x128xf32>
      %c0_62 = arith.constant 0 : index
      %c0_63 = arith.constant 0 : index
      %114 = vector.load %arg14[%c0_62, %c0_63] : memref<1x128xf32, #tpu.memory_space<vmem>>, vector<1x128xf32>
      %115 = vector.broadcast %114 : vector<1x128xf32> to vector<2x128xf32>
      %116 = arith.mulf %113, %115 : vector<2x128xf32>
      %c0_64 = arith.constant 0 : index
      %c0_65 = arith.constant 0 : index
      %117 = vector.load %arg15[%c0_64, %c0_65] : memref<1x128xf32, #tpu.memory_space<vmem>>, vector<1x128xf32>
      %118 = vector.broadcast %117 : vector<1x128xf32> to vector<2x128xf32>
      %119 = arith.addf %116, %118 : vector<2x128xf32>
      %cst_66 = arith.constant 0.000000e+00 : f32
      %120 = vector.broadcast %cst_66 : f32 to vector<2x128xf32>
      %121 = arith.maximumf %119, %120 : vector<2x128xf32>
      %122 = arith.truncf %121 : vector<2x128xf32> to vector<2x128xbf16>
      %c0_67 = arith.constant 0 : index
      %c0_68 = arith.constant 0 : index
      %123 = vector.load %arg16[%c0_67, %c0_68] : memref<128x128xbf16, #tpu.memory_space<vmem>>, vector<128x128xbf16>
      %cst_69 = arith.constant dense<0.000000e+00> : vector<2x128xf32>
      %124 = tpu.matmul %122, %123, %cst_69 {dimension_numbers = #tpu.dot_dimension_numbers<[1], [0], [0], [1], [0, 0, 1, 1], [], []>} : vector<2x128xbf16>, vector<128x128xbf16>, vector<2x128xf32> -> vector<2x128xf32>
      %c0_70 = arith.constant 0 : index
      %c0_71 = arith.constant 0 : index
      %125 = vector.load %arg17[%c0_70, %c0_71] : memref<1x128xf32, #tpu.memory_space<vmem>>, vector<1x128xf32>
      %126 = vector.broadcast %125 : vector<1x128xf32> to vector<2x128xf32>
      %127 = arith.addf %124, %126 : vector<2x128xf32>
      %cst_72 = arith.constant dense<0.000000e+00> : vector<128xf32>
      %128 = vector.multi_reduction <add>, %127, %cst_72 [0] : vector<2x128xf32> to vector<128xf32>
      %129 = vector.shape_cast %128 : vector<128xf32> to vector<1x128xf32>
      %cst_73 = arith.constant 5.000000e-01 : f32
      %130 = vector.broadcast %cst_73 : f32 to vector<1x128xf32>
      %131 = arith.mulf %129, %130 : vector<1x128xf32>
      %132 = arith.mulf %127, %127 : vector<2x128xf32>
      %cst_74 = arith.constant dense<0.000000e+00> : vector<128xf32>
      %133 = vector.multi_reduction <add>, %132, %cst_74 [0] : vector<2x128xf32> to vector<128xf32>
      %134 = vector.shape_cast %133 : vector<128xf32> to vector<1x128xf32>
      %cst_75 = arith.constant 5.000000e-01 : f32
      %135 = vector.broadcast %cst_75 : f32 to vector<1x128xf32>
      %136 = arith.mulf %134, %135 : vector<1x128xf32>
      %137 = arith.mulf %131, %131 : vector<1x128xf32>
      %138 = arith.subf %136, %137 : vector<1x128xf32>
      %139 = vector.broadcast %131 : vector<1x128xf32> to vector<2x128xf32>
      %140 = arith.subf %127, %139 : vector<2x128xf32>
      %cst_76 = arith.constant 9.99999974E-6 : f32
      %141 = vector.broadcast %cst_76 : f32 to vector<1x128xf32>
      %142 = arith.addf %138, %141 : vector<1x128xf32>
      %143 = math.rsqrt %142 : vector<1x128xf32>
      %144 = vector.broadcast %143 : vector<1x128xf32> to vector<2x128xf32>
      %145 = arith.mulf %140, %144 : vector<2x128xf32>
      %c0_77 = arith.constant 0 : index
      %c0_78 = arith.constant 0 : index
      %146 = vector.load %arg18[%c0_77, %c0_78] : memref<1x128xf32, #tpu.memory_space<vmem>>, vector<1x128xf32>
      %147 = vector.broadcast %146 : vector<1x128xf32> to vector<2x128xf32>
      %148 = arith.mulf %145, %147 : vector<2x128xf32>
      %c0_79 = arith.constant 0 : index
      %c0_80 = arith.constant 0 : index
      %149 = vector.load %arg19[%c0_79, %c0_80] : memref<1x128xf32, #tpu.memory_space<vmem>>, vector<1x128xf32>
      %150 = vector.broadcast %149 : vector<1x128xf32> to vector<2x128xf32>
      %151 = arith.addf %148, %150 : vector<2x128xf32>
      %cst_81 = arith.constant 0.000000e+00 : f32
      %152 = vector.broadcast %cst_81 : f32 to vector<2x128xf32>
      %153 = arith.maximumf %151, %152 : vector<2x128xf32>
      %154 = arith.truncf %153 : vector<2x128xf32> to vector<2x128xbf16>
      %c0_82 = arith.constant 0 : index
      %c0_83 = arith.constant 0 : index
      %155 = vector.load %arg20[%c0_82, %c0_83] : memref<128x128xbf16, #tpu.memory_space<vmem>>, vector<128x128xbf16>
      %cst_84 = arith.constant dense<0.000000e+00> : vector<2x128xf32>
      %156 = tpu.matmul %154, %155, %cst_84 {dimension_numbers = #tpu.dot_dimension_numbers<[1], [0], [0], [1], [0, 0, 1, 1], [], []>} : vector<2x128xbf16>, vector<128x128xbf16>, vector<2x128xf32> -> vector<2x128xf32>
      %c0_85 = arith.constant 0 : index
      %c0_86 = arith.constant 0 : index
      %157 = vector.load %arg21[%c0_85, %c0_86] : memref<1x128xf32, #tpu.memory_space<vmem>>, vector<1x128xf32>
      %158 = vector.broadcast %157 : vector<1x128xf32> to vector<2x128xf32>
      %159 = arith.addf %156, %158 : vector<2x128xf32>
      %c0_87 = arith.constant 0 : index
      %c0_88 = arith.constant 0 : index
      %160 = vector.load %arg22[%c0_87, %c0_88] : memref<2x128xf32, #tpu.memory_space<vmem>>, vector<2x128xf32>
      tpu.vector_store %arg22[%c0_87, %c0_88], %159 {strides = array<i32>} : memref<2x128xf32, #tpu.memory_space<vmem>>, vector<2x128xf32>,
    } else {
    }
    return
  }
  func.func @transform_0(%arg0: i32) -> (i32, i32, i32) {
    %c0_i32 = arith.constant 0 : i32
    %c0_i32_0 = arith.constant 0 : i32
    %c0_i32_1 = arith.constant 0 : i32
    return %arg0, %c0_i32, %c0_i32_0 : i32, i32, i32
  }
  func.func @transform_1(%arg0: i32) -> (i32, i32, i32) {
    %c0_i32 = arith.constant 0 : i32
    %c0_i32_0 = arith.constant 0 : i32
    %c0_i32_1 = arith.constant 0 : i32
    return %arg0, %c0_i32, %c0_i32_0 : i32, i32, i32
  }
  func.func @transform_2(%arg0: i32) -> (i32, i32, i32) {
    %c0_i32 = arith.constant 0 : i32
    %c0_i32_0 = arith.constant 0 : i32
    %c0_i32_1 = arith.constant 0 : i32
    return %arg0, %c0_i32, %c0_i32_0 : i32, i32, i32
  }
  func.func @transform_3(%arg0: i32) -> (i32, i32, i32) {
    %c0_i32 = arith.constant 0 : i32
    %c0_i32_0 = arith.constant 0 : i32
    %c0_i32_1 = arith.constant 0 : i32
    return %arg0, %c0_i32, %c0_i32_0 : i32, i32, i32
  }
  func.func @transform_4(%arg0: i32) -> (i32, i32, i32) {
    %c0_i32 = arith.constant 0 : i32
    %c0_i32_0 = arith.constant 0 : i32
    %c0_i32_1 = arith.constant 0 : i32
    return %arg0, %c0_i32, %c0_i32_0 : i32, i32, i32
  }
  func.func @transform_5(%arg0: i32) -> (i32, i32, i32) {
    %c0_i32 = arith.constant 0 : i32
    %c0_i32_0 = arith.constant 0 : i32
    %c0_i32_1 = arith.constant 0 : i32
    return %arg0, %c0_i32, %c0_i32_0 : i32, i32, i32
  }
  func.func @transform_6(%arg0: i32) -> (i32, i32, i32) {
    %c0_i32 = arith.constant 0 : i32
    %c0_i32_0 = arith.constant 0 : i32
    %c0_i32_1 = arith.constant 0 : i32
    return %arg0, %c0_i32, %c0_i32_0 : i32, i32, i32
  }
  func.func @transform_7(%arg0: i32) -> (i32, i32, i32) {
    %c0_i32 = arith.constant 0 : i32
    %c0_i32_0 = arith.constant 0 : i32
    %c0_i32_1 = arith.constant 0 : i32
    return %arg0, %c0_i32, %c0_i32_0 : i32, i32, i32
  }
  func.func @transform_8(%arg0: i32) -> (i32, i32) {
    %c0_i32 = arith.constant 0 : i32
    %c0_i32_0 = arith.constant 0 : i32
    %c0_i32_1 = arith.constant 0 : i32
    return %c0_i32, %c0_i32_0 : i32, i32
  }
  func.func @transform_9(%arg0: i32) -> (i32, i32) {
    %c0_i32 = arith.constant 0 : i32
    %c0_i32_0 = arith.constant 0 : i32
    %c0_i32_1 = arith.constant 0 : i32
    return %c0_i32, %c0_i32_0 : i32, i32
  }
  func.func @transform_10(%arg0: i32) -> (i32, i32) {
    %c0_i32 = arith.constant 0 : i32
    %c0_i32_0 = arith.constant 0 : i32
    %c0_i32_1 = arith.constant 0 : i32
    return %c0_i32, %c0_i32_0 : i32, i32
  }
  func.func @transform_11(%arg0: i32) -> (i32, i32) {
    %c0_i32 = arith.constant 0 : i32
    %c0_i32_0 = arith.constant 0 : i32
    %c0_i32_1 = arith.constant 0 : i32
    return %c0_i32, %c0_i32_0 : i32, i32
  }
  func.func @transform_12(%arg0: i32) -> (i32, i32) {
    %c0_i32 = arith.constant 0 : i32
    %c0_i32_0 = arith.constant 0 : i32
    %c0_i32_1 = arith.constant 0 : i32
    return %c0_i32, %c0_i32_0 : i32, i32
  }
  func.func @transform_13(%arg0: i32) -> (i32, i32) {
    %c0_i32 = arith.constant 0 : i32
    %c0_i32_0 = arith.constant 0 : i32
    %c0_i32_1 = arith.constant 0 : i32
    return %c0_i32, %c0_i32_0 : i32, i32
  }
  func.func @transform_14(%arg0: i32) -> (i32, i32) {
    %c0_i32 = arith.constant 0 : i32
    %c0_i32_0 = arith.constant 0 : i32
    %c0_i32_1 = arith.constant 0 : i32
    return %c0_i32, %c0_i32_0 : i32, i32
  }
  func.func @transform_15(%arg0: i32) -> (i32, i32) {
    %c0_i32 = arith.constant 0 : i32
    %c0_i32_0 = arith.constant 0 : i32
    %c0_i32_1 = arith.constant 0 : i32
    return %c0_i32, %c0_i32_0 : i32, i32
  }
  func.func @transform_16(%arg0: i32) -> (i32, i32) {
    %c0_i32 = arith.constant 0 : i32
    %c0_i32_0 = arith.constant 0 : i32
    %c0_i32_1 = arith.constant 0 : i32
    return %c0_i32, %c0_i32_0 : i32, i32
  }
  func.func @transform_17(%arg0: i32) -> (i32, i32) {
    %c0_i32 = arith.constant 0 : i32
    %c0_i32_0 = arith.constant 0 : i32
    %c0_i32_1 = arith.constant 0 : i32
    return %c0_i32, %c0_i32_0 : i32, i32
  }
  func.func @transform_18(%arg0: i32) -> (i32, i32) {
    %c0_i32 = arith.constant 0 : i32
    %c0_i32_0 = arith.constant 0 : i32
    %c0_i32_1 = arith.constant 0 : i32
    return %c0_i32, %c0_i32_0 : i32, i32
  }
  func.func @transform_19(%arg0: i32) -> (i32, i32) {
    %c0_i32 = arith.constant 0 : i32
    %c0_i32_0 = arith.constant 0 : i32
    %c0_i32_1 = arith.constant 0 : i32
    return %c0_i32, %c0_i32_0 : i32, i32
  }
  func.func @transform_20(%arg0: i32) -> (i32, i32) {
    %c0_i32 = arith.constant 0 : i32
    %c0_i32_0 = arith.constant 0 : i32
    %c0_i32_1 = arith.constant 0 : i32
    return %c0_i32, %c0_i32_0 : i32, i32
  }
  func.func @transform_21(%arg0: i32) -> (i32, i32) {
    %c0_i32 = arith.constant 0 : i32
    %c0_i32_0 = arith.constant 0 : i32
    %c0_i32_1 = arith.constant 0 : i32
    return %c0_i32, %c0_i32_0 : i32, i32
  }
}

</mosaic_0001>

<bundles_post_ra>
// kernel: tpu_custom_call.1
= control target key start
LH: loop header
LB: loop body
LE: loop exit
PB: predicated region body
PF: predicated region fallthrough
CT: control target
= control target key end

     0   :  { %s4622_s0 = inlined_call_operand.hbm [shape: bf16[2,2,392], index: 0, kind: input, shape index: {}]   ;;  %s4623_s1 = inlined_call_operand.hbm [shape: bf16[2,392,256], index: 1, kind: input, shape index: {}]   ;;  %s4624_s2 = inlined_call_operand.vmem [shape: f32[2,1,256], index: 2, kind: input, shape index: {}]   ;;  %s4625_s3 = inlined_call_operand.hbm [shape: bf16[2,256,128], index: 3, kind: input, shape index: {}]   ;;  %s4626_s4 = inlined_call_operand.vmem [shape: f32[2,1,128], index: 4, kind: input, shape index: {}]   ;;  %s4627_s5 = inlined_call_operand.hbm [shape: f32[2,1,128], index: 5, kind: input, shape index: {}]   ;;  %s4628_s6 = inlined_call_operand.hbm [shape: f32[2,1,128], index: 6, kind: input, shape index: {}]   ;;  %s4629_s7 = inlined_call_operand.hbm [shape: bf16[2,128,128], index: 7, kind: input, shape index: {}]   ;;  %s4630_s8 = inlined_call_operand.vmem [shape: f32[1,128], index: 8, kind: input, shape index: {}]   ;;  %s4631_s9 = inlined_call_operand.hbm [shape: f32[1,128], index: 9, kind: input, shape index: {}]   ;;  %s4632_s10 = inlined_call_operand.hbm [shape: f32[1,128], index: 10, kind: input, shape index: {}]   ;;  %s4633_s11 = inlined_call_operand.hbm [shape: bf16[128,128], index: 11, kind: input, shape index: {}]   ;;  %s4634_s12 = inlined_call_operand.hbm [shape: f32[1,128], index: 12, kind: input, shape index: {}]   ;;  %s4635_s13 = inlined_call_operand.hbm [shape: f32[1,128], index: 13, kind: input, shape index: {}]   ;;  %s4636_s14 = inlined_call_operand.hbm [shape: f32[1,128], index: 14, kind: input, shape index: {}]   ;;  %s4637_s15 = inlined_call_operand.hbm [shape: bf16[128,128], index: 15, kind: input, shape index: {}]   ;;  %s4638_s16 = inlined_call_operand.hbm [shape: f32[1,128], index: 16, kind: input, shape index: {}]   ;;  %s4639_s17 = inlined_call_operand.hbm [shape: f32[1,128], index: 17, kind: input, shape index: {}]   ;;  %s4640_s18 = inlined_call_operand.hbm [shape: f32[1,128], index: 18, kind: input, shape index: {}]   ;;  %s4641_s19 = inlined_call_operand.vmem [shape: bf16[128,128], index: 19, kind: input, shape index: {}]   ;;  %s4642_s20 = inlined_call_operand.vmem [shape: f32[1,128], index: 20, kind: input, shape index: {}]   ;;  %s4643_s21 = inlined_call_operand.hbm [shape: f32[2,128], index: 21, kind: output, shape index: {}]  }
   0x1   :  { %4670 = sst [smem:[#allocation45_spill]] %s4622_s0 }
   0x2   :  { %4671 = sst [smem:[#allocation46_spill]] %s4623_s1 }
   0x3   :  { %4672 = sst [smem:[#allocation47_spill]] %s4624_s2 }
   0x4   :  { %4673 = sst [smem:[#allocation48_spill]] %s4625_s3 }
   0x5   :  { %4674 = sst [smem:[#allocation49_spill]] %s4626_s4 }
   0x6   :  { %4675 = sst [smem:[#allocation50_spill]] %s4627_s5 }
   0x7   :  { %4676 = sst [smem:[#allocation51_spill]] %s4629_s7 }
   0x8   :  { %4677 = sst [smem:[#allocation52_spill]] %s4630_s8 }
   0x9   :  { %4678 = sst [smem:[#allocation53_spill]] %s4631_s9 }
   0xa   :  { %4679 = sst [smem:[#allocation54_spill]] %s4632_s10 }
   0xb   :  { %4680 = sst [smem:[#allocation55_spill]] %s4634_s12 }
   0xc   :  { %4681 = sst [smem:[#allocation56_spill]] %s4636_s14 }
   0xd   :  { %4682 = sst [smem:[#allocation57_spill]] %s4638_s16 }
   0xe   :  { %4683 = sst [smem:[#allocation58_spill]] %s4641_s19 }
   0xf   :  { %4684 = sst [smem:[#allocation59_spill]] %s4642_s20 }
  0x10   :  { %4685 = sst [smem:[#allocation60_spill]] %s4643_s21 }
  0x11   :  { %26 = vsyncpa [#allocation4], 0 }
  0x12   :  { %28 = vsyncpa [#allocation4 + $0x1], 0 }
  0x13   :  { %29 = vsyncpa [#allocation7], 0 }
  0x14   :  { %31 = vsyncpa [#allocation7 + $0x1], 0 }
  0x15   :  { %32 = vsyncpa [#allocation10], 0 }
  0x16   :  { %34 = vsyncpa [#allocation10 + $0x1], 0 }
  0x17   :  { %35 = vsyncpa [#allocation13], 0 }
  0x18   :  { %37 = vsyncpa [#allocation13 + $0x1], 0 }
  0x19   :  { %38 = vsyncpa [#allocation16], 0 }
  0x1a   :  { %39 = vsyncpa [#allocation19], 0 }
  0x1b   :  { %40 = vsyncpa [#allocation22], 0 }
  0x1c   :  { %41 = vsyncpa [#allocation25], 0 }
  0x1d   :  { %42 = vsyncpa [#allocation28], 0 }
  0x1e   :  { %43 = vsyncpa [#allocation5], 0  ;;  %s3832_s2 = smov 0   ;;  %s3834_s25 = smov 0  }
  0x1f   :  { %s3836_s26 = smov 0   ;;  %s3838_s27 = smov 0  }
  0x20 LB: > { %4686 = sst [smem:[#allocation41_spill]] %s3689_s26  ;;  %s3695_s3 = smov [#allocation14]   ;;  %s3693_s27 = sphi %s3838_s27, %s4740_s27   ;;  %s3689_s26 = sphi %s3836_s26, %s4742_s26   ;;  %s3685_s25 = sphi %s3834_s25, %s4744_s25   ;;  %s3681_s2 = sphi %s3832_s2, %s4743_s2  }
  0x21   : > { %s572_s28 = sshll.u32 %s3695_s3, 4  ;;  %s3853_s29 = sadd.s32 4294967295, %s3693_s27   ;;  %s3859_s28 = int_to_ptr.vmem [resolvable:$true] %s572_s28 }
  0x22   : > { %p2512_p0 = scmp.ge.s32.totalorder %s3693_s27, 1  ;;  %p4652_p1 = scmp.eq.s32.totalorder %s3853_s29, 0 }
  0x23   : > { %p556_p2 = scmp.lt.s32.totalorder %s3693_s27, 3  ;;  %s3696_s4 = smov [#allocation15]  }
  0x24   : > { %s583_s30 = sshll.u32 %s3696_s4, 4  ;;  %s3697_s5 = smov [#allocation18]   ;;  %s3867_s30 = int_to_ptr.vmem [resolvable:$true] %s583_s30 }
  0x25   : > { %p3861_p4 = pnand %p2512_p0, %p556_p2  ;;  %s607_s22 = sshll.u32 %s3697_s5, 4  ;;  %s3875_s22 = int_to_ptr.vmem [resolvable:$true] %s607_s22 }
  0x26   : > { %s3698_s1 = smov [#allocation21]   ;;  %s4690_s9 = sld [smem:[#allocation53_spill]] }
  0x27   : > { %s4687_s0 = scalar_select %p3861_p4, 1, 0 }
  0x28   : > { %p2877_p5 = pneg %p3861_p4  ;;  %s3877_s24 = sshll.u32 %s3698_s1, 4  ;;  %s630_s24 = int_to_ptr.vmem [resolvable:$true] %s3877_s24 }
  0x29   : > { %4688 = sst [smem:[#allocation42_spill]] %s4687_s0 }
  0x2a   : > { %p3871_p6 = pnand %p2877_p5, %p4652_p1 }
  0x2c   : > { %s4689_s23 = scalar_select %p3871_p6, 1, 0 }
  0x2d   : > { %s3133_s20 = scalar_lea.hbm %s4690_s9, 16  ;;  %p3887_p8 = pneg %p3871_p6 }
  0x2e   : > { %p3134_p7 = scmp.ne.s32.totalorder %s4690_s9, %s3133_s20  ;;  %p3140_p11 = scmp.lt.u32.totalorder %s3133_s20, %s4690_s9 }
  0x2f   : > { %s4691_s5 = scalar_select %p3887_p8, 1, 0 }
  0x30   : > { %p3136_p9 = pnand %p3887_p8, %p3134_p7 }
  0x32   : > { %p3137_p10 = pneg %p3136_p9 }
  0x34   : > { %p3142_p12 = pnand %p3140_p11, %p3137_p10 }
  0x36   : > { %3145 = shalt.err (!%p3142_p12)
}
  0x37   : > { %s3146_s19 = scalar_lea.vmem %s3859_s28, 16  ;;  %s3153_s21 = scalar_lea.vmem %s3859_s28, 32 }
  0x38   : > { %p3147_p13 = scmp.ne.s32.totalorder %s3859_s28, %s3146_s19  ;;  %p3154_p5 = scmp.lt.s32.totalorder %s3859_s28, %s3859_s28 }
  0x39   : > { %p3155_p7 = scmp.lt.s32.totalorder %s3153_s21, %s3146_s19 }
  0x3a   : > { %p3149_p0 = pnand %p3147_p13, %p3887_p8 }
  0x3b   : > { %p3156_p9 = por %p3155_p7, %p3154_p5 }
  0x3c   : > { %p3150_p2 = pneg %p3149_p0 }
  0x3e   : > { %p3157_p3 = pnand %p3156_p9, %p3150_p2 }
  0x40   : > { %3160 = shalt.err (!%p3157_p3)
}
  0x41   : > { %2880 = dma.hbm_to_vmem [thread:$0]  (!%p3871_p6), %s4690_s9, 16, %s3859_s28, [#allocation13]  }
  0x42   : > { %s4692_s10 = sld [smem:[#allocation54_spill]] }
  0x48   : > { %s3161_s1 = scalar_lea.hbm %s4692_s10, 16 }
  0x49   : > { %p3162_p10 = scmp.ne.s32.totalorder %s4692_s10, %s3161_s1  ;;  %p3168_p3 = scmp.lt.u32.totalorder %s3161_s1, %s4692_s10 }
  0x4b   : > { %p3164_p11 = pnand %p3162_p10, %p3887_p8 }
  0x4d   : > { %p3165_p12 = pneg %p3164_p11 }
  0x4f   : > { %p3170_p13 = pnand %p3168_p3, %p3165_p12 }
  0x51   : > { %3173 = shalt.err (!%p3170_p13)
}
  0x52   : > { %s3174_s28 = scalar_lea.vmem %s3867_s30, 16  ;;  %s3181_s7 = scalar_lea.vmem %s3867_s30, 32 }
  0x53   : > { %p3175_p0 = scmp.ne.s32.totalorder %s3867_s30, %s3174_s28  ;;  %p3182_p7 = scmp.lt.s32.totalorder %s3867_s30, %s3867_s30 }
  0x54   : > { %p3183_p9 = scmp.lt.s32.totalorder %s3181_s7, %s3174_s28 }
  0x55   : > { %p3177_p2 = pnand %p3175_p0, %p3887_p8 }
  0x56   : > { %p3184_p10 = por %p3183_p9, %p3182_p7 }
  0x57   : > { %p3178_p5 = pneg %p3177_p2 }
  0x59   : > { %p3185_p11 = pnand %p3184_p10, %p3178_p5 }
  0x5b   : > { %3188 = shalt.err (!%p3185_p11)
}
  0x5c   : > { %2883 = dma.hbm_to_vmem [thread:$0]  (!%p3871_p6), %s4692_s10, 16, %s3867_s30, [#allocation16]  }
  0x5d   : > { %s4693_s12 = sld [smem:[#allocation55_spill]] }
  0x63   : > { %s3189_s4 = scalar_lea.hbm %s4693_s12, 16 }
  0x64   : > { %p3190_p12 = scmp.ne.s32.totalorder %s4693_s12, %s3189_s4  ;;  %p3196_p0 = scmp.lt.u32.totalorder %s3189_s4, %s4693_s12 }
  0x66   : > { %p3192_p3 = pnand %p3190_p12, %p3887_p8 }
  0x68   : > { %p3193_p13 = pneg %p3192_p3 }
  0x6a   : > { %p3198_p2 = pnand %p3196_p0, %p3193_p13 }
  0x6c   : > { %3201 = shalt.err (!%p3198_p2)
}
  0x6d   : > { %s3202_s30 = scalar_lea.vmem %s3875_s22, 16  ;;  %s3209_s7 = scalar_lea.vmem %s3875_s22, 32 }
  0x6e   : > { %p3203_p5 = scmp.ne.s32.totalorder %s3875_s22, %s3202_s30  ;;  %p3210_p10 = scmp.lt.s32.totalorder %s3875_s22, %s3875_s22 }
  0x6f   : > { %p3211_p11 = scmp.lt.s32.totalorder %s3209_s7, %s3202_s30 }
  0x70   : > { %p3205_p7 = pnand %p3203_p5, %p3887_p8 }
  0x71   : > { %p3212_p12 = por %p3211_p11, %p3210_p10 }
  0x72   : > { %p3206_p9 = pneg %p3205_p7 }
  0x74   : > { %p3213_p3 = pnand %p3212_p12, %p3206_p9 }
  0x76   : > { %3216 = shalt.err (!%p3213_p3)
}
  0x77   : > { %2889 = dma.hbm_to_vmem [thread:$0]  (!%p3871_p6), %s4693_s12, 16, %s3875_s22, [#allocation19]  }
  0x78   : > { %s3699_s20 = smov [#allocation24]   ;;  %s4694_s14 = sld [smem:[#allocation56_spill]] }
  0x79   : > { %s653_s3 = sshll.u32 %s3699_s20, 4  ;;  %s654_s3 = int_to_ptr.vmem [resolvable:$true] %s653_s3 }
  0x7e   : > { %s3217_s19 = scalar_lea.hbm %s4694_s14, 16 }
  0x7f   : > { %p3218_p13 = scmp.ne.s32.totalorder %s4694_s14, %s3217_s19  ;;  %p3224_p5 = scmp.lt.u32.totalorder %s3217_s19, %s4694_s14 }
  0x81   : > { %p3220_p0 = pnand %p3218_p13, %p3887_p8 }
  0x83   : > { %p3221_p2 = pneg %p3220_p0 }
  0x85   : > { %p3226_p7 = pnand %p3224_p5, %p3221_p2 }
  0x87   : > { %3229 = shalt.err (!%p3226_p7)
}
  0x88   : > { %s3230_s22 = scalar_lea.vmem %s630_s24, 16  ;;  %s3237_s0 = scalar_lea.vmem %s630_s24, 32 }
  0x89   : > { %p3231_p9 = scmp.ne.s32.totalorder %s630_s24, %s3230_s22  ;;  %p3238_p12 = scmp.lt.s32.totalorder %s630_s24, %s630_s24 }
  0x8a   : > { %p3239_p3 = scmp.lt.s32.totalorder %s3237_s0, %s3230_s22 }
  0x8b   : > { %p3233_p10 = pnand %p3231_p9, %p3887_p8 }
  0x8c   : > { %p3240_p1 = por %p3239_p3, %p3238_p12 }
  0x8d   : > { %p3234_p11 = pneg %p3233_p10 }
  0x8f   : > { %p3241_p4 = pnand %p3240_p1, %p3234_p11 }
  0x91   : > { %3244 = shalt.err (!%p3241_p4)
}
  0x92   : > { %2895 = dma.hbm_to_vmem [thread:$0]  (!%p3871_p6), %s4694_s14, 16, %s630_s24, [#allocation22]  }
  0x93   : > { %s4695_s16 = sld [smem:[#allocation57_spill]] }
  0x99   : > { %s3245_s19 = scalar_lea.hbm %s4695_s16, 16 }
  0x9a   : > { %p3246_p13 = scmp.ne.s32.totalorder %s4695_s16, %s3245_s19  ;;  %p3252_p4 = scmp.lt.u32.totalorder %s3245_s19, %s4695_s16 }
  0x9c   : > { %p3248_p0 = pnand %p3246_p13, %p3887_p8 }
  0x9e   : > { %p3249_p1 = pneg %p3248_p0 }
  0xa0   : > { %p3254_p2 = pnand %p3252_p4, %p3249_p1 }
  0xa2   : > { %3257 = shalt.err (!%p3254_p2)
}
  0xa3   : > { %s3258_s22 = scalar_lea.vmem %s654_s3, 16  ;;  %s3265_s24 = scalar_lea.vmem %s654_s3, 32 }
  0xa4   : > { %p3259_p5 = scmp.ne.s32.totalorder %s654_s3, %s3258_s22  ;;  %p3266_p10 = scmp.lt.s32.totalorder %s654_s3, %s654_s3 }
  0xa5   : > { %p3267_p11 = scmp.lt.s32.totalorder %s3265_s24, %s3258_s22 }
  0xa6   : > { %p3261_p7 = pnand %p3259_p5, %p3887_p8 }
  0xa7   : > { %p3268_p12 = por %p3267_p11, %p3266_p10 }
  0xa8   : > { %p3262_p9 = pneg %p3261_p7 }
  0xaa   : > { %p3269_p3 = pnand %p3268_p12, %p3262_p9 }
  0xac   : > { %3272 = shalt.err (!%p3269_p3)
}
  0xad   : > { %2901 = dma.hbm_to_vmem [thread:$0]  (!%p3871_p6), %s4695_s16, 16, %s654_s3, [#allocation25]  }
  0xae   : > { %s3995_s20 = sadd.s32 1, %s3693_s27   ;;  %s56_s1 = sadd.s32 1, %s3689_s26 }
  0xaf   : > { %4696 = sst [smem:[#allocation43_spill]] %s3995_s20  ;;  %s53_s4 = ssub.s32 %s3693_s27, %s3995_s20 }
  0xb0   : > { %p54_p13 = scmp.eq.s32.totalorder %s53_s4, 0  ;;  %p63_p0 = scmp.ne.s32.totalorder %s3689_s26, %s3685_s25 }
  0xb1   : > { %p64_p1 = scmp.eq.s32.totalorder %s3693_s27, 0  ;;  %p69_p4 = scmp.ne.s32.totalorder %s3685_s25, %s3681_s2 }
  0xb2   : > { %s4006_s19 = scalar_select %p54_p13, %s3689_s26, %s56_s1  }
  0xb3   : > { %p65_p2 = por %p64_p1, %p63_p0  ;;  %p4698_p5 = scmp.eq.s32.totalorder %s3853_s29, 0 }
  0xb4   : > { %4697 = sst [smem:[#allocation44_spill]] %s4006_s19  ;;  %p2937_p9 = scmp.lt.s32.totalorder %s3693_s27, 2 }
  0xb5   : > { %p4010_p7 = por %p4698_p5, %p69_p4  ;;  %s4016_s3 = sand.u32 1, %s3689_s26  }
  0xb6   : > { %s4019_s28 = sand.u32 1, %s3693_s27   ;;  %s2818_s30 = smul.u32 392, %s4016_s3 }
  0xb7   : > { %s4699_s21 = scalar_select %p4010_p7, 1, 0 }
  0xb8   : > { %p4022_p10 = pnand %p2937_p9, %p65_p2  ;;  %s2819_s2 = smul.u32 6272, %s3693_s27 }
  0xb9   : > { %s715_s22 = scalar_lea.vmem [#allocation6], %s2818_s30  ;;  %s4701_s4 = sld [smem:[#allocation46_spill]] }
  0xba   : > { %s4700_s7 = scalar_select %p4022_p10, 1, 0 }
  0xbb   : > { %s722_s24 = sshll.u32 %s715_s22, 4  ;;  %p4039_p12 = pneg %p4022_p10  ;;  %s4032_s24 = int_to_ptr.vmem [resolvable:$true] %s722_s24 }
  0xbd   : > { %s4702_s12 = scalar_select %p4039_p12, 1, 0 }
  0xbf   : > { %s4030_s1 = scalar_lea.hbm %s4701_s4, %s2819_s2  ;;  %s3278_s22 = scalar_lea.hbm %s4701_s4, 12544 }
  0xc0   : > { %s3273_s10 = scalar_lea.hbm %s4030_s1, 6272  ;;  %p3279_p0 = scmp.lt.u32.totalorder %s4030_s1, %s4701_s4 }
  0xc1   : > { %p3274_p11 = scmp.ne.s32.totalorder %s4030_s1, %s3273_s10  ;;  %p3280_p1 = scmp.lt.u32.totalorder %s3278_s22, %s3273_s10 }
  0xc2   : > { %p3282_p2 = scmp.lt.u32.totalorder %s3273_s10, %s4030_s1 }
  0xc3   : > { %p3276_p3 = pnand %p4039_p12, %p3274_p11  ;;  %p3281_p4 = por %p3280_p1, %p3279_p0 }
  0xc5   : > { %p3277_p13 = pneg %p3276_p3  ;;  %p3283_p5 = por %p3282_p2, %p3281_p4 }
  0xc7   : > { %p3284_p9 = pnand %p3283_p5, %p3277_p13 }
  0xc9   : > { %3287 = shalt.err (!%p3284_p9)
}
  0xca   : > { %s3288_s9 = scalar_lea.vmem %s4032_s24, 6272  ;;  %s3700_s30 = smov [#allocation6]  }
  0xcb   : > { %p3289_p11 = scmp.ne.s32.totalorder %s4032_s24, %s3288_s9  ;;  %s3293_s2 = sshll.u32 %s3700_s30, 4  ;;  %s3294_s2 = int_to_ptr.vmem [resolvable:$false] %s3293_s2 }
  0xcc   : > { %s3295_s0 = scalar_lea.vmem %s3294_s2, 12544  ;;  %p3296_p6 = scmp.lt.s32.totalorder %s4032_s24, %s3294_s2 }
  0xcd   : > { %p3291_p3 = pnand %p3289_p11, %p4039_p12  ;;  %p3297_p8 = scmp.lt.s32.totalorder %s3295_s0, %s3288_s9 }
  0xcf   : > { %p3292_p7 = pneg %p3291_p3  ;;  %p3298_p0 = por %p3297_p8, %p3296_p6 }
  0xd1   : > { %p3299_p1 = pnand %p3298_p0, %p3292_p7 }
  0xd3   : > { %3302 = shalt.err (!%p3299_p1)
}
  0xd4   : > { %s3701_s10 = smov 128   ;;  %s3702_s22 = smov 8  }
  0xd5   : > { %s4703_s8 = scalar_lea.sflag [#allocation7], %s4019_s28  ;;  %s2531_s30 = sshll.u32 %s3693_s27, 4 }
  0xd6   : > { %2914 = dma.hbm_to_vmem [thread:$0]  (!%p4022_p10), %s4030_s1, 6272, %s4032_s24, %s4703_s8, %s3701_s10, %s3701_s10, %s3702_s22  }
  0xd7   : > { %s769_s2 = scalar_lea.vmem [#allocation9], %s4016_s3  ;;  %s4704_s14 = sld [smem:[#allocation50_spill]] }
  0xd8   : > { %s776_s9 = sshll.u32 %s769_s2, 4  ;;  %s4664_s19 = scalar_lea.sflag [#allocation10], %s4019_s28  ;;  %s777_s9 = int_to_ptr.vmem [resolvable:$true] %s776_s9 }
  0xdd   : > { %s4071_s16 = scalar_lea.hbm %s4704_s14, %s2531_s30  ;;  %s3308_s10 = scalar_lea.hbm %s4704_s14, 32 }
  0xde   : > { %s3303_s26 = scalar_lea.hbm %s4071_s16, 16  ;;  %p3309_p13 = scmp.lt.u32.totalorder %s4071_s16, %s4704_s14 }
  0xdf   : > { %p3304_p6 = scmp.ne.s32.totalorder %s4071_s16, %s3303_s26  ;;  %p3310_p4 = scmp.lt.u32.totalorder %s3308_s10, %s3303_s26 }
  0xe0   : > { %p3312_p5 = scmp.lt.u32.totalorder %s3303_s26, %s4071_s16 }
  0xe1   : > { %p3306_p8 = pnand %p3304_p6, %p4039_p12  ;;  %p3311_p2 = por %p3310_p4, %p3309_p13 }
  0xe3   : > { %p3307_p7 = pneg %p3306_p8  ;;  %p3313_p9 = por %p3312_p5, %p3311_p2 }
  0xe5   : > { %p3314_p11 = pnand %p3313_p9, %p3307_p7 }
  0xe7   : > { %3317 = shalt.err (!%p3314_p11)
}
  0xe8   : > { %s3318_s4 = scalar_lea.vmem %s777_s9, 16  ;;  %s3703_s2 = smov [#allocation9]  }
  0xe9   : > { %p3319_p3 = scmp.ne.s32.totalorder %s777_s9, %s3318_s4  ;;  %s3323_s0 = sshll.u32 %s3703_s2, 4  ;;  %s3324_s0 = int_to_ptr.vmem [resolvable:$false] %s3323_s0 }
  0xea   : > { %s3325_s24 = scalar_lea.vmem %s3324_s0, 32  ;;  %p3326_p6 = scmp.lt.s32.totalorder %s777_s9, %s3324_s0 }
  0xeb   : > { %p3321_p0 = pnand %p3319_p3, %p4039_p12  ;;  %p3327_p8 = scmp.lt.s32.totalorder %s3325_s24, %s3318_s4 }
  0xed   : > { %p3322_p1 = pneg %p3321_p0  ;;  %p3328_p10 = por %p3327_p8, %p3326_p6 }
  0xef   : > { %p3329_p4 = pnand %p3328_p10, %p3322_p1 }
  0xf1   : > { %3332 = shalt.err (!%p3329_p4)
}
  0xf2   : > { %p4705_p13 = scmp.ne.s32.totalorder %s4700_s7, 0  ;;  %s4098_s10 = scalar_lea.hbm %s4628_s6, %s2531_s30 }
  0xf3   : > { %s3704_s22 = smov [#allocation17]   ;;  %s3333_s0 = scalar_lea.hbm %s4633_s11, 1024 }
  0xf4   : > { %2920 = dma.hbm_to_vmem [thread:$0]  (!%p4705_p13), %s4071_s16, 16, %s777_s9, %s4664_s19  }
  0xf5   : > { %s593_s8 = sshll.u32 %s3704_s22, 4  ;;  %p3334_p10 = scmp.ne.s32.totalorder %s4633_s11, %s3333_s0  ;;  %s594_s8 = int_to_ptr.vmem [resolvable:$true] %s593_s8 }
  0xf6   : > { %p4706_p7 = scmp.ne.s32.totalorder %s4691_s5, 0  ;;  %p3340_p9 = scmp.lt.u32.totalorder %s3333_s0, %s4633_s11 }
  0xf8   : > { %p3336_p2 = pnand %p3334_p10, %p4706_p7 }
  0xfa   : > { %p3337_p5 = pneg %p3336_p2 }
  0xfc   : > { %p3342_p11 = pnand %p3340_p9, %p3337_p5 }
  0xfe   : > { %3345 = shalt.err (!%p3342_p11)
}
  0xff   : > { %s3346_s30 = scalar_lea.vmem %s594_s8, 1024  ;;  %p3354_p6 = scmp.lt.s32.totalorder %s594_s8, %s594_s8 }
 0x100   : > { %p3347_p3 = scmp.ne.s32.totalorder %s594_s8, %s3346_s30  ;;  %p3355_p8 = scmp.lt.s32.totalorder %s3346_s30, %s3346_s30 }
 0x102   : > { %p3349_p0 = pnand %p3347_p3, %p4706_p7  ;;  %p3356_p4 = por %p3355_p8, %p3354_p6 }
 0x104   : > { %p3350_p1 = pneg %p3349_p0 }
 0x106   : > { %p3357_p13 = pnand %p3356_p4, %p3350_p1 }
 0x108   : > { %3360 = shalt.err (!%p3357_p13)
}
 0x109   : > { %s3705_s14 = smov 64   ;;  %s3706_s26 = smov 4  }
 0x10a   : > { %p4707_p10 = scmp.ne.s32.totalorder %s4689_s23, 0  ;;  %s3707_s4 = smov [#allocation20]  }
 0x10b   : > { %s618_s2 = sshll.u32 %s3707_s4, 4  ;;  %s3708_s0 = smov [#allocation23]   ;;  %s619_s2 = int_to_ptr.vmem [resolvable:$true] %s618_s2 }
 0x10c   : > { %2886 = dma.hbm_to_vmem [thread:$0]  (!%p4707_p10), %s4633_s11, 1024, %s594_s8, [#allocation16], %s3705_s14, %s3705_s14, %s3706_s26  }
 0x10d   : > { %s639_s24 = sshll.u32 %s3708_s0, 4  ;;  %s3361_s30 = scalar_lea.hbm %s4635_s13, 16  ;;  %s4121_s24 = int_to_ptr.vmem [resolvable:$true] %s639_s24 }
 0x10e   : > { %p3362_p13 = scmp.ne.s32.totalorder %s4635_s13, %s3361_s30  ;;  %p3368_p9 = scmp.lt.u32.totalorder %s3361_s30, %s4635_s13 }
 0x110   : > { %p3364_p2 = pnand %p3362_p13, %p4706_p7 }
 0x112   : > { %p3365_p5 = pneg %p3364_p2 }
 0x114   : > { %p3370_p11 = pnand %p3368_p9, %p3365_p5 }
 0x116   : > { %3373 = shalt.err (!%p3370_p11)
}
 0x117   : > { %s3374_s22 = scalar_lea.vmem %s619_s2, 16  ;;  %s3381_s4 = scalar_lea.vmem %s619_s2, 32 }
 0x118   : > { %p3375_p3 = scmp.ne.s32.totalorder %s619_s2, %s3374_s22  ;;  %p3382_p6 = scmp.lt.s32.totalorder %s619_s2, %s619_s2 }
 0x119   : > { %p3383_p8 = scmp.lt.s32.totalorder %s3381_s4, %s3374_s22 }
 0x11a   : > { %p3377_p0 = pnand %p3375_p3, %p4706_p7 }
 0x11b   : > { %p3384_p4 = por %p3383_p8, %p3382_p6 }
 0x11c   : > { %p3378_p1 = pneg %p3377_p0 }
 0x11e   : > { %p3385_p12 = pnand %p3384_p4, %p3378_p1 }
 0x120   : > { %3388 = shalt.err (!%p3385_p12)
}
 0x121   : > { %2892 = dma.hbm_to_vmem [thread:$0]  (!%p4707_p10), %s4635_s13, 16, %s619_s2, [#allocation19]  }
 0x122   : > { %s3389_s9 = scalar_lea.hbm %s4637_s15, 1024 }
 0x123   : > { %p3390_p13 = scmp.ne.s32.totalorder %s4637_s15, %s3389_s9  ;;  %p3396_p12 = scmp.lt.u32.totalorder %s3389_s9, %s4637_s15 }
 0x125   : > { %p3392_p2 = pnand %p3390_p13, %p4706_p7 }
 0x127   : > { %p3393_p5 = pneg %p3392_p2 }
 0x129   : > { %p3398_p9 = pnand %p3396_p12, %p3393_p5 }
 0x12b   : > { %3401 = shalt.err (!%p3398_p9)
}
 0x12c   : > { %s3402_s2 = scalar_lea.vmem %s4121_s24, 1024  ;;  %p3410_p1 = scmp.lt.s32.totalorder %s4121_s24, %s4121_s24 }
 0x12d   : > { %p3403_p11 = scmp.ne.s32.totalorder %s4121_s24, %s3402_s2  ;;  %p3411_p6 = scmp.lt.s32.totalorder %s3402_s2, %s3402_s2 }
 0x12f   : > { %p3405_p3 = pnand %p3403_p11, %p4706_p7  ;;  %p3412_p8 = por %p3411_p6, %p3410_p1 }
 0x131   : > { %p3406_p0 = pneg %p3405_p3 }
 0x133   : > { %p3413_p4 = pnand %p3412_p8, %p3406_p0 }
 0x135   : > { %3416 = shalt.err (!%p3413_p4)
}
 0x136   : > { %2898 = dma.hbm_to_vmem [thread:$0]  (!%p4707_p10), %s4637_s15, 1024, %s4121_s24, [#allocation22], %s3705_s14, %s3705_s14, %s3706_s26  }
 0x137   : > { %s3709_s19 = smov [#allocation26]   ;;  %s3710_s16 = smov [#allocation27]  }
 0x138   : > { %s664_s0 = sshll.u32 %s3709_s19, 4  ;;  %s675_s9 = sshll.u32 %s3710_s16, 4  ;;  %s665_s0 = int_to_ptr.vmem [resolvable:$true] %s664_s0  ;;  %s4167_s9 = int_to_ptr.vmem [resolvable:$true] %s675_s9 }
 0x139   : > { %s3417_s8 = scalar_lea.hbm %s4639_s17, 16 }
 0x13a   : > { %p3418_p13 = scmp.ne.s32.totalorder %s4639_s17, %s3417_s8  ;;  %p3424_p12 = scmp.lt.u32.totalorder %s3417_s8, %s4639_s17 }
 0x13c   : > { %p3420_p2 = pnand %p3418_p13, %p4706_p7 }
 0x13e   : > { %p3421_p5 = pneg %p3420_p2 }
 0x140   : > { %p3426_p9 = pnand %p3424_p12, %p3421_p5 }
 0x142   : > { %3429 = shalt.err (!%p3426_p9)
}
 0x143   : > { %s3430_s20 = scalar_lea.vmem %s665_s0, 16  ;;  %s3437_s19 = scalar_lea.vmem %s665_s0, 32 }
 0x144   : > { %p3431_p11 = scmp.ne.s32.totalorder %s665_s0, %s3430_s20  ;;  %p3438_p1 = scmp.lt.s32.totalorder %s665_s0, %s665_s0 }
 0x145   : > { %p3439_p6 = scmp.lt.s32.totalorder %s3437_s19, %s3430_s20 }
 0x146   : > { %p3433_p3 = pnand %p3431_p11, %p4706_p7 }
 0x147   : > { %p3440_p8 = por %p3439_p6, %p3438_p1 }
 0x148   : > { %p3434_p0 = pneg %p3433_p3 }
 0x14a   : > { %p3441_p4 = pnand %p3440_p8, %p3434_p0 }
 0x14c   : > { %3444 = shalt.err (!%p3441_p4)
}
 0x14d   : > { %2904 = dma.hbm_to_vmem [thread:$0]  (!%p4707_p10), %s4639_s17, 16, %s665_s0, [#allocation25]  }
 0x14e   : > { %s3445_s22 = scalar_lea.hbm %s4640_s18, 16 }
 0x14f   : > { %p3446_p13 = scmp.ne.s32.totalorder %s4640_s18, %s3445_s22  ;;  %p3452_p12 = scmp.lt.u32.totalorder %s3445_s22, %s4640_s18 }
 0x151   : > { %p3448_p2 = pnand %p3446_p13, %p4706_p7 }
 0x153   : > { %p3449_p5 = pneg %p3448_p2 }
 0x155   : > { %p3454_p9 = pnand %p3452_p12, %p3449_p5 }
 0x157   : > { %3457 = shalt.err (!%p3454_p9)
}
 0x158   : > { %s3458_s0 = scalar_lea.vmem %s4167_s9, 16  ;;  %s3465_s19 = scalar_lea.vmem %s4167_s9, 32 }
 0x159   : > { %p3459_p11 = scmp.ne.s32.totalorder %s4167_s9, %s3458_s0  ;;  %p3466_p1 = scmp.lt.s32.totalorder %s4167_s9, %s4167_s9 }
 0x15a   : > { %p3467_p6 = scmp.lt.s32.totalorder %s3465_s19, %s3458_s0 }
 0x15b   : > { %p3461_p3 = pnand %p3459_p11, %p4706_p7 }
 0x15c   : > { %p3468_p8 = por %p3467_p6, %p3466_p1 }
 0x15d   : > { %p3462_p0 = pneg %p3461_p3 }
 0x15f   : > { %p3469_p4 = pnand %p3468_p8, %p3462_p0 }
 0x161   : > { %3472 = shalt.err (!%p3469_p4)
}
 0x162   : > { %2907 = dma.hbm_to_vmem [thread:$0]  (!%p4707_p10), %s4640_s18, 16, %s4167_s9, [#allocation28]  }
 0x163   : > { %s2524_s5 = sshll.u32 %s4016_s3, 2  ;;  %s2671_s1 = sshll.u32 %s3693_s27, 6 }
 0x164   : > { %s4708_s2 = sld [smem:[#allocation45_spill]]  ;;  %s696_s23 = scalar_lea.vmem [#allocation3], %s2524_s5 }
 0x165   : > { %s704_s20 = sshll.u32 %s696_s23, 4  ;;  %s2528_s0 = sshll.u32 %s4016_s3, 7  ;;  %s4218_s20 = int_to_ptr.vmem [resolvable:$true] %s704_s20 }
 0x166   : > { %s693_s19 = scalar_lea.sflag [#allocation4], %s4016_s3  ;;  %p4710_p10 = scmp.ne.s32.totalorder %s4702_s12, 0 }
 0x16a   : > { %s4709_s4 = smov %s4708_s2  ;;  %s4216_s24 = scalar_lea.hbm %s4708_s2, %s2671_s1 }
 0x16b   : > { %s3473_s16 = scalar_lea.hbm %s4216_s24, 64  ;;  %s3478_s1 = scalar_lea.hbm %s4709_s4, 128 }
 0x16c   : > { %p3474_p7 = scmp.ne.s32.totalorder %s4216_s24, %s3473_s16  ;;  %p3479_p5 = scmp.lt.u32.totalorder %s4216_s24, %s4709_s4 }
 0x16d   : > { %p3480_p12 = scmp.lt.u32.totalorder %s3478_s1, %s3473_s16  ;;  %p3482_p11 = scmp.lt.u32.totalorder %s3473_s16, %s4216_s24 }
 0x16e   : > { %p3476_p13 = pnand %p3474_p7, %p4710_p10 }
 0x16f   : > { %p3481_p9 = por %p3480_p12, %p3479_p5 }
 0x170   : > { %p3477_p2 = pneg %p3476_p13 }
 0x171   : > { %p3483_p3 = por %p3482_p11, %p3481_p9 }
 0x173   : > { %p3484_p0 = pnand %p3483_p3, %p3477_p2 }
 0x175   : > { %3487 = shalt.err (!%p3484_p0)
}
 0x176   : > { %s3488_s5 = scalar_lea.vmem %s4218_s20, 64  ;;  %s3711_s2 = smov [#allocation3]  }
 0x177   : > { %p3489_p1 = scmp.ne.s32.totalorder %s4218_s20, %s3488_s5  ;;  %s3493_s23 = sshll.u32 %s3711_s2, 4  ;;  %s3494_s23 = int_to_ptr.vmem [resolvable:$false] %s3493_s23 }
 0x178   : > { %s3495_s9 = scalar_lea.vmem %s3494_s23, 128  ;;  %p3496_p4 = scmp.lt.s32.totalorder %s4218_s20, %s3494_s23 }
 0x179   : > { %p3491_p6 = pnand %p3489_p1, %p4710_p10  ;;  %p3497_p7 = scmp.lt.s32.totalorder %s3495_s9, %s3488_s5 }
 0x17b   : > { %p3492_p8 = pneg %p3491_p6  ;;  %p3498_p13 = por %p3497_p7, %p3496_p4 }
 0x17d   : > { %p3499_p5 = pnand %p3498_p13, %p3492_p8 }
 0x17f   : > { %3502 = shalt.err (!%p3499_p5)
}
 0x180   : > { %p4711_p2 = scmp.ne.s32.totalorder %s4700_s7, 0  ;;  %s2672_s16 = sshll.u32 %s3693_s27, 11 }
 0x181   : > { %s4712_s8 = sld [smem:[#allocation48_spill]]  ;;  %s743_s5 = scalar_lea.vmem [#allocation8], %s2528_s0 }
 0x182   : > { %2911 = dma.hbm_to_vmem [thread:$0]  (!%p4711_p2), %s4216_s24, 64, %s4218_s20, %s693_s19  }
 0x183   : > { %s750_s2 = sshll.u32 %s743_s5, 4  ;;  %s4251_s2 = int_to_ptr.vmem [resolvable:$true] %s750_s2 }
 0x187   : > { %s4247_s22 = scalar_lea.hbm %s4712_s8, %s2672_s16  ;;  %s3508_s19 = scalar_lea.hbm %s4712_s8, 4096 }
 0x188   : > { %s3503_s23 = scalar_lea.hbm %s4247_s22, 2048  ;;  %p3509_p3 = scmp.lt.u32.totalorder %s4247_s22, %s4712_s8 }
 0x189   : > { %p3504_p12 = scmp.ne.s32.totalorder %s4247_s22, %s3503_s23  ;;  %p3510_p0 = scmp.lt.u32.totalorder %s3508_s19, %s3503_s23 }
 0x18a   : > { %p3512_p6 = scmp.lt.u32.totalorder %s3503_s23, %s4247_s22 }
 0x18b   : > { %p3506_p9 = pnand %p3504_p12, %p4710_p10  ;;  %p3511_p1 = por %p3510_p0, %p3509_p3 }
 0x18d   : > { %p3507_p11 = pneg %p3506_p9  ;;  %p3513_p8 = por %p3512_p6, %p3511_p1 }
 0x18f   : > { %p3514_p4 = pnand %p3513_p8, %p3507_p11 }
 0x191   : > { %3517 = shalt.err (!%p3514_p4)
}
 0x192   : > { %s3518_s0 = scalar_lea.vmem %s4251_s2, 2048  ;;  %s3712_s30 = smov [#allocation8]  }
 0x193   : > { %p3519_p7 = scmp.ne.s32.totalorder %s4251_s2, %s3518_s0  ;;  %s3523_s1 = sshll.u32 %s3712_s30, 4  ;;  %s3524_s1 = int_to_ptr.vmem [resolvable:$false] %s3523_s1 }
 0x194   : > { %s3525_s5 = scalar_lea.vmem %s3524_s1, 4096  ;;  %p3526_p12 = scmp.lt.s32.totalorder %s4251_s2, %s3524_s1 }
 0x195   : > { %p3521_p13 = pnand %p3519_p7, %p4710_p10  ;;  %p3527_p9 = scmp.lt.s32.totalorder %s3525_s5, %s3518_s0 }
 0x197   : > { %p3522_p5 = pneg %p3521_p13  ;;  %p3528_p3 = por %p3527_p9, %p3526_p12 }
 0x199   : > { %p3529_p0 = pnand %p3528_p3, %p3522_p5 }
 0x19b   : > { %3532 = shalt.err (!%p3529_p0)
}
 0x19c   : > { %s4713_s23 = scalar_lea.sflag [#allocation7], %s4019_s28  ;;  %s786_s24 = scalar_lea.vmem [#allocation11], %s4016_s3 }
 0x19d   : > { %2917 = dma.hbm_to_vmem [thread:$0]  (!%p4711_p2), %s4247_s22, 2048, %s4251_s2, %s4713_s23, %s3705_s14, %s3705_s14, %s3706_s26  }
 0x19e   : > { %s793_s20 = sshll.u32 %s786_s24, 4  ;;  %s2533_s19 = sshll.u32 %s4016_s3, 6  ;;  %s794_s20 = int_to_ptr.vmem [resolvable:$true] %s793_s20 }
 0x19f   : > { %s3533_s9 = scalar_lea.hbm %s4098_s10, 16  ;;  %s3538_s30 = scalar_lea.hbm %s4628_s6, 32 }
 0x1a0   : > { %p3534_p11 = scmp.ne.s32.totalorder %s4098_s10, %s3533_s9  ;;  %p3539_p8 = scmp.lt.u32.totalorder %s4098_s10, %s4628_s6 }
 0x1a1   : > { %p3540_p4 = scmp.lt.u32.totalorder %s3538_s30, %s3533_s9  ;;  %p3542_p13 = scmp.lt.u32.totalorder %s3533_s9, %s4098_s10 }
 0x1a2   : > { %p3536_p1 = pnand %p3534_p11, %p4710_p10 }
 0x1a3   : > { %p3541_p7 = por %p3540_p4, %p3539_p8 }
 0x1a4   : > { %p3537_p6 = pneg %p3536_p1 }
 0x1a5   : > { %p3543_p5 = por %p3542_p13, %p3541_p7 }
 0x1a7   : > { %p3544_p12 = pnand %p3543_p5, %p3537_p6 }
 0x1a9   : > { %3547 = shalt.err (!%p3544_p12)
}
 0x1aa   : > { %s3548_s22 = scalar_lea.vmem %s794_s20, 16  ;;  %s3713_s2 = smov [#allocation11]  }
 0x1ab   : > { %p3549_p9 = scmp.ne.s32.totalorder %s794_s20, %s3548_s22  ;;  %s3553_s23 = sshll.u32 %s3713_s2, 4  ;;  %s3554_s23 = int_to_ptr.vmem [resolvable:$false] %s3553_s23 }
 0x1ac   : > { %s3555_s24 = scalar_lea.vmem %s3554_s23, 32  ;;  %p3556_p11 = scmp.lt.s32.totalorder %s794_s20, %s3554_s23 }
 0x1ad   : > { %p3551_p3 = pnand %p3549_p9, %p4710_p10  ;;  %p3557_p1 = scmp.lt.s32.totalorder %s3555_s24, %s3548_s22 }
 0x1af   : > { %p3552_p0 = pneg %p3551_p3  ;;  %p3558_p2 = por %p3557_p1, %p3556_p11 }
 0x1b1   : > { %p3559_p4 = pnand %p3558_p2, %p3552_p0 }
 0x1b3   : > { %3562 = shalt.err (!%p3559_p4)
}
 0x1b4   : > { %p4714_p8 = scmp.ne.s32.totalorder %s4700_s7, 0  ;;  %s4715_s9 = scalar_lea.sflag [#allocation10], %s4019_s28 }
 0x1b5   : > { %s2673_s16 = sshll.u32 %s3693_s27, 10  ;;  %s4716_s1 = sld [smem:[#allocation51_spill]] }
 0x1b6   : > { %2923 = dma.hbm_to_vmem [thread:$0]  (!%p4714_p8), %s4098_s10, 16, %s794_s20, %s4715_s9  }
 0x1b7   : > { %s804_s22 = scalar_lea.vmem [#allocation12], %s2533_s19  ;;  %s801_s23 = scalar_lea.sflag [#allocation13], %s4019_s28 }
 0x1b8   : > { %s811_s2 = sshll.u32 %s804_s22, 4  ;;  %s4308_s2 = int_to_ptr.vmem [resolvable:$true] %s811_s2 }
 0x1bb   : > { %s4304_s5 = scalar_lea.hbm %s4716_s1, %s2673_s16  ;;  %s3568_s20 = scalar_lea.hbm %s4716_s1, 2048 }
 0x1bc   : > { %s3563_s24 = scalar_lea.hbm %s4304_s5, 1024  ;;  %p3569_p13 = scmp.lt.u32.totalorder %s4304_s5, %s4716_s1 }
 0x1bd   : > { %p3564_p2 = scmp.ne.s32.totalorder %s4304_s5, %s3563_s24  ;;  %p3570_p5 = scmp.lt.u32.totalorder %s3568_s20, %s3563_s24 }
 0x1be   : > { %p3572_p9 = scmp.lt.u32.totalorder %s3563_s24, %s4304_s5 }
 0x1bf   : > { %p3566_p6 = pnand %p3564_p2, %p4710_p10  ;;  %p3571_p12 = por %p3570_p5, %p3569_p13 }
 0x1c1   : > { %p3567_p7 = pneg %p3566_p6  ;;  %p3573_p3 = por %p3572_p9, %p3571_p12 }
 0x1c3   : > { %p3574_p0 = pnand %p3573_p3, %p3567_p7 }
 0x1c5   : > { %3577 = shalt.err (!%p3574_p0)
}
 0x1c6   : > { %s3578_s19 = scalar_lea.vmem %s4308_s2, 1024  ;;  %s3714_s16 = smov [#allocation12]  }
 0x1c7   : > { %p3579_p11 = scmp.ne.s32.totalorder %s4308_s2, %s3578_s19  ;;  %s3583_s0 = sshll.u32 %s3714_s16, 4  ;;  %s3584_s0 = int_to_ptr.vmem [resolvable:$false] %s3583_s0 }
 0x1c8   : > { %s3585_s30 = scalar_lea.vmem %s3584_s0, 2048  ;;  %p3586_p2 = scmp.lt.s32.totalorder %s4308_s2, %s3584_s0 }
 0x1c9   : > { %p3581_p1 = pnand %p3579_p11, %p4710_p10  ;;  %p3587_p6 = scmp.lt.s32.totalorder %s3585_s30, %s3578_s19 }
 0x1cb   : > { %p3582_p4 = pneg %p3581_p1  ;;  %p3588_p13 = por %p3587_p6, %p3586_p2 }
 0x1cd   : > { %p3589_p5 = pnand %p3588_p13, %p3582_p4 }
 0x1cf   : > { %3592 = shalt.err (!%p3589_p5)
}
 0x1d0   : > { %2926 = dma.hbm_to_vmem [thread:$0]  (!%p4714_p8), %s4304_s5, 1024, %s4308_s2, %s801_s23, %s3705_s14, %s3705_s14, %s3706_s26  }
 0x1d1   : > { %s4717_s12 = sld [smem:[#allocation42_spill]] }
 0x1d7   : > { %p4718_p10 = scmp.ne.s32.totalorder %s4717_s12, 0 }
 0x1d8   : > { %s4340_s22 = sand.u32 (!%p4718_p10), 1, %s3685_s25   ;;  %p4719_p7 = scmp.ne.s32.totalorder (!%p4718_p10), %s4699_s21, 0 }
 0x1d9   : > { %823 = sbr.rel (%p4718_p10) target bundleno = 2124 (0x84c), region = 104  ;;  %s2537_s24 = sshll.u32 (!%p4718_p10), %s4340_s22, 2 }
 0x1da   : > { %s826_s27 = scalar_lea.sflag (!%p4718_p10), [#allocation4], %s4340_s22  ;;  %s4344_s7 = scalar_lea.vmem (!%p4718_p10), [#allocation3], %s2537_s24 }
 0x1e0   : > { %3636 = dma.done.wait (%p4719_p7), %s826_s27, 64  }
 0x1e1   : > { %3638 = vsyncadd (%p4719_p7), %s826_s27, 4294967232  ;;  %s834_s28 = sand.u32 1, %s3853_s29   ;;  %s2820_s14 = smul.u32 392, %s4340_s22 }
 0x1e2   : > { %s835_s26 = scalar_lea.sflag [#allocation7], %s834_s28 }
 0x1e3   : > { %s4352_s5 = scalar_lea.vmem [#allocation6], %s2820_s14 }
 0x1e4   : > { %3640 = dma.done.wait (%p4719_p7), %s835_s26, 8320  }
 0x1e5   : > { %3642 = vsyncadd (%p4719_p7), %s835_s26, 4294958976  ;;  %s2538_s2 = sshll.u32 %s4340_s22, 7  ;;  %s853_s10 = scalar_lea.sflag [#allocation10], %s834_s28 }
 0x1e6   : > { %s4359_s23 = scalar_lea.vmem [#allocation8], %s2538_s2  ;;  %s855_s20 = scalar_lea.vmem [#allocation9], %s4340_s22 }
 0x1e7   : > { %3644 = dma.done.wait (%p4719_p7), %s853_s10, 32  }
 0x1e8   : > { %3646 = vsyncadd (%p4719_p7), %s853_s10, 4294967264  ;;  %s2539_s9 = sshll.u32 %s4340_s22, 6  ;;  %s863_s3 = scalar_lea.vmem [#allocation11], %s4340_s22 }
 0x1e9   : > { %s869_s19 = scalar_lea.sflag [#allocation13], %s834_s28  ;;  %s4368_s16 = scalar_lea.vmem [#allocation12], %s2539_s9 }
 0x1ea   : > { %3648 = dma.done.wait (%p4719_p7), %s869_s19, 1024  }
 0x1eb   : > { %3650 = vsyncadd (%p4719_p7), %s869_s19, 4294966272  ;;  %p4720_p8 = scmp.eq.s32.totalorder %s3853_s29, 0 }
 0x1ed   : > { %3652 = dma.done.wait (%p4720_p8), [#allocation13], 16   ;;  %p4721_p12 = pmov %p4720_p8 }
 0x1ee   : > { %p4722_p9 = pmov %p4720_p8 }
 0x1ef   : > { %3654 = vsyncadd (%p4721_p12), [#allocation13], 4294967280 }
 0x1f0   : > { %3656 = dma.done.wait (%p4722_p9), [#allocation16], 1040   ;;  %p4723_p3 = pmov %p4720_p8 }
 0x1f2   : > { %3658 = vsyncadd (%p4723_p3), [#allocation16], 4294966256  ;;  %p4724_p0 = pmov %p4723_p3 }
 0x1f4   : > { %3660 = dma.done.wait (%p4724_p0), [#allocation19], 32   ;;  %p4725_p11 = pmov %p4724_p0 }
 0x1f5   : > { %p4726_p1 = pmov %p4724_p0 }
 0x1f6   : > { %3662 = vsyncadd (%p4725_p11), [#allocation19], 4294967264 }
 0x1f7   : > { %3664 = dma.done.wait (%p4726_p1), [#allocation22], 1040   ;;  %p4727_p4 = pmov %p4724_p0 }
 0x1f8   : > { %p4728_p2 = pmov %p4724_p0 }
 0x1f9   : > { %3666 = vsyncadd (%p4727_p4), [#allocation22], 4294966256 }
 0x1fa   : > { %3668 = dma.done.wait (%p4728_p2), [#allocation25], 32   ;;  %p4729_p6 = pmov %p4724_p0 }
 0x1fb   : > { %p4730_p13 = pmov %p4724_p0 }
 0x1fc   : > { %3670 = vsyncadd (%p4729_p6), [#allocation25], 4294967264 }
 0x1fd   : > { %3672 = dma.done.wait (%p4730_p13), [#allocation28], 16   ;;  %p4731_p5 = pmov %p4724_p0 }
 0x1fe   : > { %p996_p10 = scmp.lt.s32.totalorder %s3853_s29, 1  ;;  %s4732_s24 = sld [smem:[#allocation49_spill]] }
 0x1ff   : > { %3674 = vsyncadd (%p4731_p5), [#allocation28], 4294967280  ;;  %s4733_s26 = sld [smem:[#allocation47_spill]]  ;;  %p4734_p7 = scmp.ne.s32.totalorder %s3853_s29, 0 }
 0x200   : > { %s4400_s21 = scalar_select %p996_p10, %s3853_s29, 1 }
 0x201   : > { %1007 = sbr.rel (%p4734_p7) target bundleno = 520 (0x208), region = 172  ;;  %v3715_v0 = vmov (!%p4734_p7), 0.0  }
 0x202   : > { %s2550_s0 = sshll.u32 %s4400_s21, 1  ;;  %1008 = vst [vmem:[#allocation2] sm:$0x3] (!%p4734_p7), %v3715_v0 }
 0x204   : > { %s1002_s27 = scalar_lea.vmem %s4732_s24, %s4400_s21 }
 0x205   : > { %s4410_s2 = scalar_lea.vmem %s4733_s26, %s2550_s0 }
 0x208 PF: > { %v3003_v1 = vld [vmem:[%s4352_s5 + $0x4] ss:$8 sps:$4 sm:$0xff]   ;;  %v3005_v2 = vld [vmem:[%s4352_s5] ss:$8 sps:$4 sm:$0xff]   ;;  %v3006_v3 = vld [vmem:[%s4352_s5 + $0x14] ss:$8 sps:$4 sm:$0xff]   ;;  %v1061_v10 = vlaneseq }
 0x209   : > { %1355 = vmatprep.subr.bf16.mxu0 %v3003_v1  ;;  %v3008_v4 = vld [vmem:[%s4352_s5 + $0x10] ss:$8 sps:$4 sm:$0xff]   ;;  %v3009_v5 = vld [vmem:[%s4352_s5 + $0x24] ss:$8 sps:$4 sm:$0xff]   ;;  %v3011_v6 = vld [vmem:[%s4352_s5 + $0x20] ss:$8 sps:$4 sm:$0xff]  }
 0x20a   : > { %1356 = vmatpush1.bf16.msra.mxu0 %v3005_v2  ;;  %v3012_v7 = vld [vmem:[%s4352_s5 + $0x34] ss:$8 sps:$4 sm:$0xff]   ;;  %v3014_v8 = vld [vmem:[%s4352_s5 + $0x30] ss:$8 sps:$4 sm:$0xff]   ;;  %v3015_v9 = vld [vmem:[%s4352_s5 + $0x44] ss:$8 sps:$4 sm:$0xff]  }
 0x20b   : > { %1357 = vmatprep.subr.bf16.mxu0 %v3006_v3  ;;  %v3716_v11 = vmov 1966171168   ;;  %v3017_v13 = vld [vmem:[%s4352_s5 + $0x40] ss:$8 sps:$4 sm:$0xff]   ;;  %v3018_v14 = vld [vmem:[%s4352_s5 + $0x54] ss:$8 sps:$4 sm:$0xff]  }
 0x20c   : > { %v1081_v12 = vunpack.c.l.s4 %v3716_v11  ;;  %v4425_v15 = vshrl.u32 %v1061_v10, 7  ;;  %v3020_v17 = vld [vmem:[%s4352_s5 + $0x50] ss:$8 sps:$4 sm:$0xff]   ;;  %v3021_v18 = vld [vmem:[%s4352_s5 + $0x64] ss:$8 sps:$4 sm:$0xff]   ;;  %vm1344_vm0 = vcmask 64512  }
 0x20d   : > { %v4433_v20 = vld.sshfl [vmem:[%s4344_s7] sm:$0x33 pattern:$0x75316420]  ;;  %v3023_v22 = vld [vmem:[%s4352_s5 + $0x60] ss:$8 sps:$4 sm:$0xff]  }
 0x20e   : > { %1358 = vmatpush1.bf16.msra.mxu0 %v3008_v4  ;;  %v1082_v16 = vunpack.c.0.s8 %v1081_v12  ;;  %v1079_v21 = vcombine.high %v4433_v20, %v4433_v20  ;;  %v3024_v23 = vld [vmem:[%s4352_s5 + $0x74] ss:$8 sps:$4 sm:$0xff]   ;;  %v3026_v25 = vld [vmem:[%s4352_s5 + $0x70] ss:$8 sps:$4 sm:$0xff]   ;;  %v3027_v26 = vld [vmem:[%s4352_s5 + $0x84] ss:$8 sps:$4 sm:$0xff]  }
 0x20f   : > { %1359 = vmatprep.subr.bf16.mxu0 %v3009_v5  ;;  %v3029_v27 = vld [vmem:[%s4352_s5 + $0x80] ss:$8 sps:$4 sm:$0xff]   ;;  %v3030_v28 = vld [vmem:[%s4352_s5 + $0x94] ss:$8 sps:$4 sm:$0xff]   ;;  %v3032_v29 = vld [vmem:[%s4352_s5 + $0x90] ss:$8 sps:$4 sm:$0xff]  }
 0x210   : > { %v4430_v19 = vsub.s32 %v1082_v16, %v4425_v15  ;;  %v3077_v30 = vld [vmem:[%s4359_s23 + $0x40] sm:$0xff]   ;;  %v3079_v33 = vld [vmem:[%s4359_s23 + $0x48] sm:$0xff]   ;;  %v3081_v35 = vld [vmem:[%s4359_s23 + $0x50] sm:$0xff]   ;;  %vm1348_vm1 = vcmask 1043456   ;;  %vm3718_vm2 = vmmov 0   ;;  %vm1616_vm3 = vcmask 1041408  }
 0x211   : > { %v3033_v31 = vld [vmem:[%s4352_s5 + $0xa4] ss:$8 sps:$4 sm:$0xff]   ;;  %2674 = vmatprep.subr.bf16.mxu1 %v3077_v30  ;;  %v3080_v34 = vld [vmem:[%s4359_s23 + $0x8] sm:$0xff]   ;;  %v3035_v36 = vld [vmem:[%s4352_s5 + $0xa0] ss:$8 sps:$4 sm:$0xff]   ;;  %p2632_p8 = scmp.ne.s32.totalorder %s3853_s29, 1 }
 0x212   : > { %1360 = vmatpush1.bf16.msra.mxu0 %v3011_v6  ;;  %v4440_v24 = vrot.slane %v1079_v21, %v4430_v19  ;;  %v3078_v32 = vld [vmem:[%s4359_s23] sm:$0xff]   ;;  %v3082_v38 = vld [vmem:[%s4359_s23 + $0x10] sm:$0xff]   ;;  %v3083_v39 = vld [vmem:[%s4359_s23 + $0x58] sm:$0xff]   ;;  %v1086_v55 = vrot.slane %v4433_v20, %v4430_v19  ;;  %v1067_v20 = vsub.s32 1, %v4425_v15  ;;  %vm3720_vm4 = vmmov (!%p2632_p8), 0   ;;  %s4737_s19 = sld [smem:[#allocation58_spill]] (!%p2632_p8) }
 0x213   : > { %1361 = vmatprep.subr.bf16.mxu0 %v3012_v7  ;;  %2675 = vmatpush3.bf16.msra.mxu1 %v3078_v32  ;;  %v3036_v37 = vld [vmem:[%s4352_s5 + $0xb4] ss:$8 sps:$4 sm:$0xff]   ;;  %v3038_v40 = vld [vmem:[%s4352_s5 + $0xb0] ss:$8 sps:$4 sm:$0xff]   ;;  %v3039_v41 = vld [vmem:[%s4352_s5 + $0xc4] ss:$8 sps:$4 sm:$0xff]  }
 0x214   : > { %1387 = vmatprep.mubr.bf16.mxu0 %v4440_v24  ;;  %2676 = vmatprep.subr.bf16.mxu1 %v3079_v33  ;;  %v3084_v42 = vld [vmem:[%s4359_s23 + $0x18] sm:$0xff]   ;;  %v3085_v44 = vld [vmem:[%s4359_s23 + $0x60] sm:$0xff]   ;;  %v3087_v47 = vld [vmem:[%s4359_s23 + $0x68] sm:$0xff]   ;;  %v1095_v56 = vcombine.high %v4440_v24, %v4440_v24  ;;  %v1094_v12 = vcombine.high %v1086_v55, %v1086_v55 }
 0x215   : > { %v3041_v43 = vld [vmem:[%s4352_s5 + $0xc0] ss:$8 sps:$4 sm:$0xff]   ;;  %v3042_v45 = vld [vmem:[%s4352_s5 + $0xd4] ss:$8 sps:$4 sm:$0xff]   ;;  %v3044_v48 = vld [vmem:[%s4352_s5 + $0xd0] ss:$8 sps:$4 sm:$0xff]  }
 0x216   : > { %1362 = vmatpush1.bf16.msra.mxu0 %v3014_v8  ;;  %v3086_v46 = vld [vmem:[%s4359_s23 + $0x20] sm:$0xff]   ;;  %v3088_v50 = vld [vmem:[%s4359_s23 + $0x28] sm:$0xff]   ;;  %v1058_v7 = vld [vmem:[%s4352_s5 + $0x180] sm:$0xff] }
 0x217   : > { %1363 = vmatprep.subr.bf16.mxu0 %v3015_v9  ;;  %2677 = vmatpush3.bf16.msra.mxu1 %v3080_v34  ;;  %v3045_v49 = vld [vmem:[%s4352_s5 + $0xe4] ss:$8 sps:$4 sm:$0xff]   ;;  %v3047_v51 = vld [vmem:[%s4352_s5 + $0xe0] ss:$8 sps:$4 sm:$0xff]   ;;  %v3048_v52 = vld [vmem:[%s4352_s5 + $0xf4] ss:$8 sps:$4 sm:$0xff]   ;;  %v2602_v9 = vcombine.high %v1058_v7, %v1058_v7  ;;  %v2601_v10 = vcombine.low %v1058_v7, %v1058_v7 }
 0x218   : > { %2678 = vmatprep.subr.bf16.mxu1 %v3081_v35  ;;  %v3050_v53 = vld [vmem:[%s4352_s5 + $0xf0] ss:$8 sps:$4 sm:$0xff]   ;;  %v3053_v54 = vld [vmem:[%s4352_s5 + $0x104] ss:$8 sps:$4 sm:$0xff]   ;;  %v3051_v57 = vld [vmem:[%s4352_s5 + $0x100] ss:$8 sps:$4 sm:$0xff]  }
 0x219   : > { %v3056_v58 = vld [vmem:[%s4352_s5 + $0x114] ss:$8 sps:$4 sm:$0xff]   ;;  %v3054_v59 = vld [vmem:[%s4352_s5 + $0x110] ss:$8 sps:$4 sm:$0xff]   ;;  %v3059_v60 = vld [vmem:[%s4352_s5 + $0x124] ss:$8 sps:$4 sm:$0xff]  }
 0x21a   : > { %1364 = vmatpush1.bf16.msra.mxu0 %v3017_v13  ;;  %v3057_v61 = vld [vmem:[%s4352_s5 + $0x120] ss:$8 sps:$4 sm:$0xff]   ;;  %v3062_v62 = vld [vmem:[%s4352_s5 + $0x134] ss:$8 sps:$4 sm:$0xff]   ;;  %v3060_v63 = vld [vmem:[%s4352_s5 + $0x130] ss:$8 sps:$4 sm:$0xff]  }
 0x21b   : > { %1365 = vmatprep.subr.bf16.mxu0 %v3018_v14  ;;  %2679 = vmatpush3.bf16.msra.mxu1 %v3082_v38  ;;  %v3065_v0 = vld [vmem:[%s4352_s5 + $0x144] ss:$8 sps:$4 sm:$0xff]   ;;  %v3063_v1 = vld [vmem:[%s4352_s5 + $0x140] ss:$8 sps:$4 sm:$0xff]   ;;  %v3068_v2 = vld [vmem:[%s4352_s5 + $0x154] ss:$8 sps:$4 sm:$0xff]  }
 0x21c   : > { %2680 = vmatprep.subr.bf16.mxu1 %v3083_v39  ;;  %v3066_v3 = vld [vmem:[%s4352_s5 + $0x150] ss:$8 sps:$4 sm:$0xff]   ;;  %v3071_v4 = vld [vmem:[%s4352_s5 + $0x164] ss:$8 sps:$4 sm:$0xff]   ;;  %v3069_v5 = vld [vmem:[%s4352_s5 + $0x160] ss:$8 sps:$4 sm:$0xff]  }
 0x21d   : > { %v3074_v6 = vld [vmem:[%s4352_s5 + $0x174] ss:$8 sps:$4 sm:$0xff]   ;;  %v3072_v8 = vld [vmem:[%s4352_s5 + $0x170] ss:$8 sps:$4 sm:$0xff]   ;;  %v1350_v11 = vsel %vm1348_vm1, %v2601_v10, 0  ;;  %v3091_v16 = vld [vmem:[%s4359_s23 + $0x78] sm:$0xff]  }
 0x21e   : > { %1366 = vmatpush1.bf16.msra.mxu0 %v3020_v17  ;;  %v3089_v13 = vld [vmem:[%s4359_s23 + $0x70] sm:$0xff]   ;;  %v3092_v17 = vld [vmem:[%s4359_s23 + $0x38] sm:$0xff]   ;;  %v1059_v19 = vld [vmem:[%s4410_s2] sm:$0x3] }
 0x21f   : > { %1367 = vmatprep.subr.bf16.mxu0 %v3021_v18  ;;  %2681 = vmatpush3.bf16.msra.mxu1 %v3084_v42  ;;  %v3090_v14 = vld [vmem:[%s4359_s23 + $0x30] sm:$0xff]   ;;  %v1063_v18 = vsub.s32 0, %v4425_v15  ;;  %v3093_v33 = vld [vmem:[%s4368_s16] sm:$0xff]   ;;  %v3717_v15 = vmov 0.0  }
 0x220   : > { %2682 = vmatprep.subr.bf16.mxu1 %v3085_v44  ;;  %v3094_v34 = vld [vmem:[%s4368_s16 + $0x8] sm:$0xff]   ;;  %v3095_v35 = vld [vmem:[%s4368_s16 + $0x10] sm:$0xff]   ;;  %v2605_v42 = vld [vmem:[%s1002_s27] ss:$0 sm:$0xff] }
 0x221   : > { %v1064_v21 = vrot.slane %v1059_v19, %v1063_v18  ;;  %v3098_v38 = vld [vmem:[%s4368_s16 + $0x28] sm:$0xff]   ;;  %v3099_v39 = vld [vmem:[%s4368_s16 + $0x30] sm:$0xff]  }
 0x222   : > { %1368 = vmatpush1.bf16.msra.mxu0 %v3023_v22  ;;  %v1068_v22 = vrot.slane %v1059_v19, %v1067_v20  ;;  %v3103_v20 = vld [vmem:[#allocation17] sm:$0xff] (!%p2632_p8)  }
 0x223   : > { %1369 = vmatprep.subr.bf16.mxu0 %v3024_v23  ;;  %2683 = vmatpush3.bf16.msra.mxu1 %v3086_v46 }
 0x224   : > { %2684 = vmatprep.subr.bf16.mxu1 %v3087_v47 }
 0x226   : > { %1370 = vmatpush1.bf16.msra.mxu0 %v3026_v25 }
 0x227   : > { %1371 = vmatprep.subr.bf16.mxu0 %v3027_v26  ;;  %2685 = vmatpush3.bf16.msra.mxu1 %v3088_v50 }
 0x228   : > { %2686 = vmatprep.subr.bf16.mxu1 %v3089_v13  ;;  %v1657_v13 = vld [vmem:[#allocation2] sm:$0x3] }
 0x22a   : > { %1372 = vmatpush1.bf16.msra.mxu0 %v3029_v27 }
 0x22b   : > { %1373 = vmatprep.subr.bf16.mxu0 %v3030_v28  ;;  %2687 = vmatpush3.bf16.msra.mxu1 %v3090_v14 }
 0x22c   : > { %2688 = vmatprep.subr.bf16.mxu1 %v3091_v16 }
 0x22e   : > { %1374 = vmatpush1.bf16.msra.mxu0 %v3032_v29 }
 0x22f   : > { %1375 = vmatprep.subr.bf16.mxu0 %v3033_v31  ;;  %2689 = vmatpush3.bf16.msra.mxu1 %v3092_v17 }
 0x230   : > { %2732 = vmatprep.subr.bf16.mxu1 %v3717_v15 }
 0x232   : > { %1376 = vmatpush1.bf16.msra.mxu0 %v3035_v36  ;;  %v3096_v36 = vld [vmem:[%s4368_s16 + $0x18] sm:$0xff]  }
 0x233   : > { %1377 = vmatprep.subr.bf16.mxu0 %v3036_v37  ;;  %v3097_v37 = vld [vmem:[%s4368_s16 + $0x20] sm:$0xff]  }
 0x236   : > { %1378 = vmatpush1.bf16.msra.mxu0 %v3038_v40  ;;  %v3100_v40 = vld [vmem:[%s4368_s16 + $0x38] sm:$0xff]  }
 0x237   : > { %1379 = vmatprep.subr.bf16.mxu0 %v3039_v41 }
 0x23a   : > { %1380 = vmatpush1.bf16.msra.mxu0 %v3041_v43 }
 0x23b   : > { %1381 = vmatprep.subr.bf16.mxu0 %v3042_v45 }
 0x23e   : > { %1382 = vmatpush1.bf16.msra.mxu0 %v3044_v48 }
 0x23f   : > { %1383 = vmatprep.subr.bf16.mxu0 %v3045_v49 }
 0x242   : > { %1384 = vmatpush1.bf16.msra.mxu0 %v3047_v51 }
 0x243   : > { %1385 = vmatprep.subr.bf16.mxu0 %v3048_v52 }
 0x246   : > { %1386 = vmatpush1.bf16.msra.mxu0 %v3050_v53 }
 0x247   : > { %1396 = vmatprep.subr.bf16.mxu0 %v3053_v54 }
 0x249   : > { %1388 = vmatmul.mubr.bf16.vlgmr.msra.gmra.mrb[0].mxu0 %v1086_v55 }
 0x24a   : > { %1397 = vmatpush1.bf16.msra.mxu0 %v3051_v57  ;;  %2604 = vmatprep.mubr.msk.bf16.mxu0 %vm1344_vm0, %v1095_v56 }
 0x24b   : > { %1398 = vmatprep.subr.bf16.mxu0 %v3056_v58 }
 0x24e   : > { %1399 = vmatpush1.bf16.msra.mxu0 %v3054_v59 }
 0x24f   : > { %1400 = vmatprep.subr.bf16.mxu0 %v3059_v60 }
 0x252   : > { %1401 = vmatpush1.bf16.msra.mxu0 %v3057_v61 }
 0x253   : > { %1402 = vmatprep.subr.bf16.mxu0 %v3062_v62 }
 0x256   : > { %1403 = vmatpush1.bf16.msra.mxu0 %v3060_v63 }
 0x257   : > { %1404 = vmatprep.subr.bf16.mxu0 %v3065_v0 }
 0x25a   : > { %1405 = vmatpush1.bf16.msra.mxu0 %v3063_v1 }
 0x25b   : > { %1406 = vmatprep.subr.bf16.mxu0 %v3068_v2 }
 0x25e   : > { %1407 = vmatpush1.bf16.msra.mxu0 %v3066_v3 }
 0x25f   : > { %1408 = vmatprep.subr.bf16.mxu0 %v3071_v4 }
 0x262   : > { %1409 = vmatpush1.bf16.msra.mxu0 %v3069_v5 }
 0x263   : > { %1410 = vmatprep.subr.bf16.mxu0 %v3074_v6  ;;  %v2622_v6 = vld [vmem:[%s855_s20] ss:$0 sm:$0xff]  ;;  %s4736_s20 = sld [smem:[#allocation52_spill]] (!%p2632_p8) }
 0x266   : > { %1411 = vmatpush1.bf16.msra.mxu0 %v3072_v8  ;;  %v2623_v8 = vld [vmem:[%s863_s3] ss:$0 sm:$0xff] }
 0x267   : > { %2603 = vmatprep.subr.msk.bf16.mxu0 %vm1348_vm1, %v2602_v9 }
 0x26a   : > { %1413 = vmatpush1.bf16.msra.mxu0 %v1350_v11 }
 0x26d   : > { %1429 = vmatmul.mubr.bf16.vlgmr.msra.gmra.mrb[0].mxu0 %v1094_v12 }
 0x340   : > { %v1430_v23 = vpop.f32.mrb[0].mxu0 }
 0x341   : > { %v2812_v24 = vadd.f32 %v1430_v23, %v1064_v21  ;;  %v1432_v25 = vpop.f32.mrb[1].mxu0  ;;  %v3719_v21 = vmov (!%p2632_p8), 0.0   ;;  %v3105_v23 = vld [vmem:[#allocation17 + $0x10] sm:$0xff] (!%p2632_p8)  }
 0x342   : > { %v2813_v26 = vadd.f32 %v1432_v25, %v1068_v22  ;;  %v1434_v27 = vpop.f32.mrb[2].mxu0  ;;  %2752 = vmatprep.subr.bf16.mxu0 (!%p2632_p8), %v3719_v21  ;;  %v3104_v22 = vld [vmem:[#allocation17 + $0x8] sm:$0xff] (!%p2632_p8)   ;;  %2768 = vmatprep.mubr.msk.bf16.mxu0 (!%p2632_p8), %vm3720_vm4, %v3719_v21  ;;  %v2633_v25 = vld [vmem:[%s4736_s20] ss:$0 sm:$0xff] (!%p2632_p8)  ;;  %s4738_s20 = sld [smem:[#allocation59_spill]] (!%p2632_p8) }
 0x343   : > { %v1437_v28 = vmax.f32 %v2812_v24, 0.0  ;;  %v1435_v29 = vpop.f32.mrb[3].mxu0  ;;  %2753 = vmatpush3.bf16.msra.mxu0 (!%p2632_p8), %v3103_v20 }
 0x344   : > { %v1438_v30 = vmax.f32 %v2813_v26, 0.0  ;;  %2754 = vmatprep.subr.bf16.mxu0 (!%p2632_p8), %v3719_v21  ;;  %v3106_v26 = vld [vmem:[#allocation17 + $0x18] sm:$0xff] (!%p2632_p8)  }
 0x345   : > { %v1439_v32 = vpack.c.bf16 %v1437_v28, %v1437_v28 }
 0x346   : > { %v1440_v31 = vpack.c.bf16 %v1438_v30, %v1438_v30 }
 0x347   : > { %2755 = vmatpush3.bf16.msra.mxu0 (!%p2632_p8), %v3104_v22 }
 0x348   : > { %1608 = vmatprep.mubr.bf16.mxu1 %v1440_v31  ;;  %2756 = vmatprep.subr.bf16.mxu0 (!%p2632_p8), %v3719_v21 }
 0x349   : > { %1609 = vmatmul.mubr.bf16.vlgmr.msra.gmra.mrb[0].mxu1 %v1439_v32  ;;  %v3107_v32 = vld [vmem:[#allocation17 + $0x20] sm:$0xff] (!%p2632_p8)  }
 0x34a   : > { %2733 = vmatpush3.bf16.msra.mxu1 %v3093_v33  ;;  %2748 = vmatprep.mubr.msk.bf16.mxu1 %vm3718_vm2, %v3717_v15 }
 0x34b   : > { %2734 = vmatprep.subr.bf16.mxu1 %v3717_v15  ;;  %2757 = vmatpush3.bf16.msra.mxu0 (!%p2632_p8), %v3105_v23 }
 0x34c   : > { %2758 = vmatprep.subr.bf16.mxu0 (!%p2632_p8), %v3719_v21 }
 0x34e   : > { %2735 = vmatpush3.bf16.msra.mxu1 %v3094_v34 }
 0x34f   : > { %2736 = vmatprep.subr.bf16.mxu1 %v3717_v15  ;;  %2759 = vmatpush3.bf16.msra.mxu0 (!%p2632_p8), %v3106_v26 }
 0x350   : > { %2760 = vmatprep.subr.bf16.mxu0 (!%p2632_p8), %v3719_v21 }
 0x352   : > { %2737 = vmatpush3.bf16.msra.mxu1 %v3095_v35 }
 0x353   : > { %2738 = vmatprep.subr.bf16.mxu1 %v3717_v15  ;;  %2761 = vmatpush3.bf16.msra.mxu0 (!%p2632_p8), %v3107_v32 }
 0x354   : > { %2762 = vmatprep.subr.bf16.mxu0 (!%p2632_p8), %v3719_v21 }
 0x356   : > { %2739 = vmatpush3.bf16.msra.mxu1 %v3096_v36  ;;  %v3108_v36 = vld [vmem:[#allocation17 + $0x28] sm:$0xff] (!%p2632_p8)  }
 0x357   : > { %2740 = vmatprep.subr.bf16.mxu1 %v3717_v15  ;;  %2763 = vmatpush3.bf16.msra.mxu0 (!%p2632_p8), %v3108_v36 }
 0x358   : > { %2764 = vmatprep.subr.bf16.mxu0 (!%p2632_p8), %v3719_v21 }
 0x35a   : > { %2741 = vmatpush3.bf16.msra.mxu1 %v3097_v37 }
 0x35b   : > { %2742 = vmatprep.subr.bf16.mxu1 %v3717_v15 }
 0x35e   : > { %2743 = vmatpush3.bf16.msra.mxu1 %v3098_v38 }
 0x35f   : > { %2744 = vmatprep.subr.bf16.mxu1 %v3717_v15 }
 0x362   : > { %2745 = vmatpush3.bf16.msra.mxu1 %v3099_v39 }
 0x363   : > { %2746 = vmatprep.subr.bf16.mxu1 %v3717_v15 }
 0x366   : > { %2747 = vmatpush3.bf16.msra.mxu1 %v3100_v40 }
 0x367   : > { %2772 = vmatprep.subr.bf16.mxu1 (!%p2632_p8), %v3719_v21 }
 0x41c   : > { %v2690_v41 = vpop.f32.mrb[0].mxu1 }
 0x41d   : > { %v2691_v43 = vpop.f32.mrb[1].mxu1 }
 0x41e   : > { %v2692_v44 = vadd.f32 %v2691_v43, %v2690_v41  ;;  %v2693_v45 = vpop.f32.mrb[2].mxu1  ;;  %v3109_v41 = vld [vmem:[#allocation17 + $0x30] sm:$0xff] (!%p2632_p8)  }
 0x41f   : > { %v2694_v46 = vpop.f32.mrb[3].mxu1  ;;  %2765 = vmatpush3.bf16.msra.mxu0 (!%p2632_p8), %v3109_v41  ;;  %v3120_v41 = vld [vmem:[%s4737_s19 + $0x8] sm:$0xff] (!%p2632_p8)  }
 0x420   : > { %v1611_v47 = vadd.f32 %v2692_v44, %v2605_v42  ;;  %v3110_v46 = vld [vmem:[#allocation17 + $0x38] sm:$0xff] (!%p2632_p8)   ;;  %2766 = vmatprep.subr.bf16.mxu0 (!%p2632_p8), %v3719_v21 }
 0x422   : > { %v1617_v48 = vsel %vm1616_vm3, %v1611_v47, 0.0  ;;  %v1625_v49 = vmul.f32 %v1611_v47, %v1611_v47 }
 0x423   : > { %v1618_v50 = vrot.slane %v1617_v48, 4  ;;  %2767 = vmatpush3.bf16.msra.mxu0 (!%p2632_p8), %v3110_v46  ;;  %v3125_v46 = vld [vmem:[%s4737_s19 + $0x30] sm:$0xff] (!%p2632_p8)  }
 0x424   : > { %v1626_v51 = vsel %vm1616_vm3, %v1625_v49, 0.0  ;;  %2792 = vmatprep.subr.bf16.mxu0 (!%p2632_p8), %v3719_v21 }
 0x425   : > { %v1619_v52 = vadd.f32 %v1618_v50, %v1617_v48  ;;  %v1627_v53 = vrot.slane %v1626_v51, 4 }
 0x427   : > { %v1620_v54 = vrot.slane %v1619_v52, 2  ;;  %v1628_v55 = vadd.f32 %v1627_v53, %v1626_v51  ;;  %v2634_v53 = vld [vmem:[#allocation14] ss:$0 sm:$0xff] (!%p2632_p8) }
 0x429   : > { %v1621_v56 = vadd.f32 %v1620_v54, %v1619_v52  ;;  %v1629_v57 = vrot.slane %v1628_v55, 2 }
 0x42b   : > { %v1622_v58 = vrot.slane %v1621_v56, 1  ;;  %v1630_v59 = vadd.f32 %v1629_v57, %v1628_v55  ;;  %v2635_v55 = vld [vmem:[#allocation15] ss:$0 sm:$0xff] (!%p2632_p8) }
 0x42d   : > { %v1623_v60 = vadd.f32 %v1622_v58, %v1621_v56  ;;  %v1631_v61 = vrot.slane %v1630_v59, 1 }
 0x42f   : > { %v1624_v62 = vmul.f32 0.5, %v1623_v60  ;;  %v1632_v63 = vadd.f32 %v1631_v61, %v1630_v59  ;;  %v3111_v60 = vld [vmem:[#allocation23] sm:$0xff] (!%p2632_p8)   ;;  %v3112_v61 = vld [vmem:[#allocation23 + $0x8] sm:$0xff] (!%p2632_p8)  }
 0x431   : > { %v1633_v0 = vmul.f32 0.5, %v1632_v63  ;;  %v1634_v1 = vmul.f32 %v1624_v62, %v1624_v62  ;;  %v1636_v4 = vsub.f32 %v1611_v47, %v1624_v62  ;;  %v3113_v62 = vld [vmem:[#allocation23 + $0x10] sm:$0xff] (!%p2632_p8)   ;;  %v3114_v63 = vld [vmem:[#allocation23 + $0x18] sm:$0xff] (!%p2632_p8)  }
 0x433   : > { %v1635_v2 = vsub.f32 %v1633_v0, %v1634_v1  ;;  %v3115_v0 = vld [vmem:[#allocation23 + $0x20] sm:$0xff] (!%p2632_p8)   ;;  %v3116_v1 = vld [vmem:[#allocation23 + $0x28] sm:$0xff] (!%p2632_p8)  }
 0x435   : > { %v1637_v3 = vadd.f32 1e-05, %v1635_v2  ;;  %v3117_v2 = vld [vmem:[#allocation23 + $0x30] sm:$0xff] (!%p2632_p8)  }
 0x437   : > { %3101 = vrsqrt.f32 %v1637_v3  ;;  %v3118_v3 = vld [vmem:[#allocation23 + $0x38] sm:$0xff] (!%p2632_p8)  }
 0x441   : > { %v3102_v5 = vpop.eup %3101 }
 0x442   : > { %v1639_v7 = vmul.f32 %v3102_v5, %v1636_v4  ;;  %v2636_v4 = vld [vmem:[#allocation18] ss:$0 sm:$0xff] (!%p2632_p8) }
 0x444   : > { %v1647_v9 = vmul.f32 %v2622_v6, %v1639_v7 }
 0x446   : > { %v1655_v10 = vadd.f32 %v2623_v8, %v1647_v9 }
 0x448   : > { %v1656_v11 = vmax.f32 %v1655_v10, 0.0 }
 0x44a   : > { %v1658_v12 = vpack.c.bf16 %v1656_v11, %v1656_v11 }
 0x44c   : > { %2749 = vmatmul.mubr.bf16.vlgmr.msra.gmra.mrb[4].mxu1 %v1658_v12 }
 0x44d   : > { %2788 = vmatprep.mubr.msk.bf16.mxu1 (!%p2632_p8), %vm3720_vm4, %v3719_v21  ;;  %2773 = vmatpush3.bf16.msra.mxu1 (!%p2632_p8), %v3111_v60 }
 0x44e   : > { %2774 = vmatprep.subr.bf16.mxu1 (!%p2632_p8), %v3719_v21 }
 0x451   : > { %2775 = vmatpush3.bf16.msra.mxu1 (!%p2632_p8), %v3112_v61 }
 0x452   : > { %2776 = vmatprep.subr.bf16.mxu1 (!%p2632_p8), %v3719_v21 }
 0x455   : > { %2777 = vmatpush3.bf16.msra.mxu1 (!%p2632_p8), %v3113_v62 }
 0x456   : > { %2778 = vmatprep.subr.bf16.mxu1 (!%p2632_p8), %v3719_v21 }
 0x459   : > { %2779 = vmatpush3.bf16.msra.mxu1 (!%p2632_p8), %v3114_v63 }
 0x45a   : > { %2780 = vmatprep.subr.bf16.mxu1 (!%p2632_p8), %v3719_v21 }
 0x45d   : > { %2781 = vmatpush3.bf16.msra.mxu1 (!%p2632_p8), %v3115_v0 }
 0x45e   : > { %2782 = vmatprep.subr.bf16.mxu1 (!%p2632_p8), %v3719_v21 }
 0x461   : > { %2783 = vmatpush3.bf16.msra.mxu1 (!%p2632_p8), %v3116_v1 }
 0x462   : > { %2784 = vmatprep.subr.bf16.mxu1 (!%p2632_p8), %v3719_v21 }
 0x465   : > { %2785 = vmatpush3.bf16.msra.mxu1 (!%p2632_p8), %v3117_v2 }
 0x466   : > { %2786 = vmatprep.subr.bf16.mxu1 (!%p2632_p8), %v3719_v21 }
 0x469   : > { %2787 = vmatpush3.bf16.msra.mxu1 (!%p2632_p8), %v3118_v3 }
 0x51c   : > { %1768 = sbr.rel (%p2632_p8) target bundleno = 2093 (0x82d), region = 176 }
 0x51f   : > { %v1757_v14 = vpop.f32.mrb[4].mxu1 }
 0x520   : > { %v1763_v16 = vadd.f32 %v1757_v14, %v1657_v13  ;;  %v2750_v17 = vpop.f32.mrb[5].mxu1 }
 0x521   : > { %v1760_v18 = vpop.f32.mrb[6].mxu1 }
 0x522   : > { %1764 = vst [vmem:[#allocation2] sm:$0x3] %v1763_v16  ;;  %v2751_v19 = vpop.f32.mrb[7].mxu1 }
 0x529   : > { %v1769_v24 = vld [vmem:[#allocation2] sm:$0x3] }
 0x52a   : > { %v1777_v27 = vadd.f32 %v2633_v25, %v1769_v24 }
 0x52c   : > { %v1778_v28 = vsel %vm1616_vm3, %v1777_v27, 0.0  ;;  %v1786_v29 = vmul.f32 %v1777_v27, %v1777_v27 }
 0x52d   : > { %v1779_v30 = vrot.slane %v1778_v28, 4 }
 0x52e   : > { %v1787_v31 = vsel %vm1616_vm3, %v1786_v29, 0.0 }
 0x52f   : > { %v1780_v33 = vadd.f32 %v1779_v30, %v1778_v28  ;;  %v1788_v15 = vrot.slane %v1787_v31, 4 }
 0x531   : > { %v1781_v34 = vrot.slane %v1780_v33, 2  ;;  %v1789_v35 = vadd.f32 %v1788_v15, %v1787_v31  ;;  %v2645_v15 = vld [vmem:[#allocation20] ss:$0 sm:$0xff] }
 0x533   : > { %v1782_v37 = vadd.f32 %v1781_v34, %v1780_v33  ;;  %v1790_v38 = vrot.slane %v1789_v35, 2 }
 0x535   : > { %v1783_v39 = vrot.slane %v1782_v37, 1  ;;  %v1791_v40 = vadd.f32 %v1790_v38, %v1789_v35  ;;  %v2646_v35 = vld [vmem:[#allocation21] ss:$0 sm:$0xff] }
 0x537   : > { %v1784_v42 = vadd.f32 %v1783_v39, %v1782_v37  ;;  %v1792_v43 = vrot.slane %v1791_v40, 1 }
 0x539   : > { %v1785_v44 = vmul.f32 0.5, %v1784_v42  ;;  %v1793_v45 = vadd.f32 %v1792_v43, %v1791_v40  ;;  %v3119_v40 = vld [vmem:[%s4737_s19] sm:$0xff]   ;;  %v3121_v42 = vld [vmem:[%s4737_s19 + $0x10] sm:$0xff]   ;;  %v3122_v43 = vld [vmem:[%s4737_s19 + $0x18] sm:$0xff]  }
 0x53b   : > { %v1794_v47 = vmul.f32 0.5, %v1793_v45  ;;  %v1795_v48 = vmul.f32 %v1785_v44, %v1785_v44  ;;  %v1797_v51 = vsub.f32 %v1777_v27, %v1785_v44  ;;  %v3123_v44 = vld [vmem:[%s4737_s19 + $0x20] sm:$0xff]   ;;  %v3124_v45 = vld [vmem:[%s4737_s19 + $0x28] sm:$0xff]  }
 0x53d   : > { %v1796_v49 = vsub.f32 %v1794_v47, %v1795_v48  ;;  %v3126_v47 = vld [vmem:[%s4737_s19 + $0x38] sm:$0xff]   ;;  %v2647_v48 = vld [vmem:[#allocation24] ss:$0 sm:$0xff] }
 0x53f   : > { %v1798_v50 = vadd.f32 1e-05, %v1796_v49 }
 0x541   : > { %3127 = vrsqrt.f32 %v1798_v50 }
 0x54b   : > { %v3128_v52 = vpop.eup %3127 }
 0x54c   : > { %v1800_v54 = vmul.f32 %v3128_v52, %v1797_v51 }
 0x54e   : > { %v1808_v56 = vmul.f32 %v2634_v53, %v1800_v54 }
 0x550   : > { %v1816_v57 = vadd.f32 %v2635_v55, %v1808_v56 }
 0x552   : > { %v1817_v58 = vmax.f32 %v1816_v57, 0.0 }
 0x554   : > { %v1818_v59 = vpack.c.bf16 %v1817_v58, %v1817_v58 }
 0x556   : > { %2769 = vmatmul.mubr.bf16.vlgmr.msra.gmra.mrb[0].mxu0 %v1818_v59 }
 0x557   : > { %2808 = vmatprep.mubr.msk.bf16.mxu0 %vm3720_vm4, %v3719_v21  ;;  %2793 = vmatpush3.bf16.msra.mxu0 %v3119_v40 }
 0x558   : > { %2794 = vmatprep.subr.bf16.mxu0 %v3719_v21 }
 0x55b   : > { %2795 = vmatpush3.bf16.msra.mxu0 %v3120_v41 }
 0x55c   : > { %2796 = vmatprep.subr.bf16.mxu0 %v3719_v21 }
 0x55f   : > { %2797 = vmatpush3.bf16.msra.mxu0 %v3121_v42 }
 0x560   : > { %2798 = vmatprep.subr.bf16.mxu0 %v3719_v21 }
 0x563   : > { %2799 = vmatpush3.bf16.msra.mxu0 %v3122_v43 }
 0x564   : > { %2800 = vmatprep.subr.bf16.mxu0 %v3719_v21 }
 0x567   : > { %2801 = vmatpush3.bf16.msra.mxu0 %v3123_v44 }
 0x568   : > { %2802 = vmatprep.subr.bf16.mxu0 %v3719_v21 }
 0x56b   : > { %2803 = vmatpush3.bf16.msra.mxu0 %v3124_v45 }
 0x56c   : > { %2804 = vmatprep.subr.bf16.mxu0 %v3719_v21 }
 0x56f   : > { %2805 = vmatpush3.bf16.msra.mxu0 %v3125_v46 }
 0x570   : > { %2806 = vmatprep.subr.bf16.mxu0 %v3719_v21 }
 0x573   : > { %2807 = vmatpush3.bf16.msra.mxu0 %v3126_v47 }
 0x629   : > { %v1924_v5 = vpop.f32.mrb[0].mxu0 }
 0x62a   : > { %v1925_v6 = vadd.f32 %v2636_v4, %v1924_v5  ;;  %v2770_v7 = vpop.f32.mrb[1].mxu0 }
 0x62b   : > { %v1927_v8 = vpop.f32.mrb[2].mxu0 }
 0x62c   : > { %v1930_v9 = vsel %vm1616_vm3, %v1925_v6, 0.0  ;;  %v1938_v10 = vmul.f32 %v1925_v6, %v1925_v6  ;;  %v2771_v11 = vpop.f32.mrb[3].mxu0 }
 0x62d   : > { %v1931_v12 = vrot.slane %v1930_v9, 4  ;;  %v2656_v11 = vld [vmem:[#allocation26] ss:$0 sm:$0xff] }
 0x62e   : > { %v1939_v13 = vsel %vm1616_vm3, %v1938_v10, 0.0 }
 0x62f   : > { %v1932_v14 = vadd.f32 %v1931_v12, %v1930_v9  ;;  %v1940_v16 = vrot.slane %v1939_v13, 4 }
 0x631   : > { %v1933_v17 = vrot.slane %v1932_v14, 2  ;;  %v1941_v18 = vadd.f32 %v1940_v16, %v1939_v13  ;;  %v2657_v13 = vld [vmem:[#allocation27] ss:$0 sm:$0xff] }
 0x633   : > { %v1934_v19 = vadd.f32 %v1933_v17, %v1932_v14  ;;  %v1942_v20 = vrot.slane %v1941_v18, 2 }
 0x635   : > { %v1935_v22 = vrot.slane %v1934_v19, 1  ;;  %v1943_v23 = vadd.f32 %v1942_v20, %v1941_v18 }
 0x637   : > { %v1936_v24 = vadd.f32 %v1935_v22, %v1934_v19  ;;  %v1944_v25 = vrot.slane %v1943_v23, 1  ;;  %v2658_v19 = vld [vmem:[%s4738_s20] ss:$0 sm:$0xff] }
 0x639   : > { %v1937_v26 = vmul.f32 0.5, %v1936_v24  ;;  %v1945_v27 = vadd.f32 %v1944_v25, %v1943_v23 }
 0x63b   : > { %v1946_v28 = vmul.f32 0.5, %v1945_v27  ;;  %v1947_v29 = vmul.f32 %v1937_v26, %v1937_v26  ;;  %v1949_v32 = vsub.f32 %v1925_v6, %v1937_v26 }
 0x63d   : > { %v1948_v30 = vsub.f32 %v1946_v28, %v1947_v29 }
 0x63f   : > { %v1950_v31 = vadd.f32 1e-05, %v1948_v30 }
 0x641   : > { %3129 = vrsqrt.f32 %v1950_v31 }
 0x64b   : > { %v3130_v33 = vpop.eup %3129 }
 0x64c   : > { %v1952_v34 = vmul.f32 %v3130_v33, %v1949_v32 }
 0x64e   : > { %v1960_v36 = vmul.f32 %v2645_v15, %v1952_v34 }
 0x650   : > { %v1968_v37 = vadd.f32 %v2646_v35, %v1960_v36 }
 0x652   : > { %v1969_v38 = vmax.f32 %v1968_v37, 0.0 }
 0x654   : > { %v1970_v39 = vpack.c.bf16 %v1969_v38, %v1969_v38 }
 0x656   : > { %2789 = vmatmul.mubr.bf16.vlgmr.msra.gmra.mrb[0].mxu1 %v1970_v39 }
 0x729   : > { %v2076_v49 = vpop.f32.mrb[0].mxu1 }
 0x72a   : > { %v2077_v50 = vadd.f32 %v2647_v48, %v2076_v49  ;;  %v2790_v51 = vpop.f32.mrb[1].mxu1 }
 0x72b   : > { %v2079_v52 = vpop.f32.mrb[2].mxu1 }
 0x72c   : > { %v2082_v53 = vsel %vm1616_vm3, %v2077_v50, 0.0  ;;  %v2090_v54 = vmul.f32 %v2077_v50, %v2077_v50  ;;  %v2791_v55 = vpop.f32.mrb[3].mxu1 }
 0x72d   : > { %v2083_v56 = vrot.slane %v2082_v53, 4 }
 0x72e   : > { %v2091_v57 = vsel %vm1616_vm3, %v2090_v54, 0.0 }
 0x72f   : > { %v2084_v58 = vadd.f32 %v2083_v56, %v2082_v53  ;;  %v2092_v59 = vrot.slane %v2091_v57, 4 }
 0x731   : > { %v2085_v60 = vrot.slane %v2084_v58, 2  ;;  %v2093_v61 = vadd.f32 %v2092_v59, %v2091_v57 }
 0x733   : > { %v2086_v62 = vadd.f32 %v2085_v60, %v2084_v58  ;;  %v2094_v63 = vrot.slane %v2093_v61, 2 }
 0x735   : > { %v2087_v21 = vrot.slane %v2086_v62, 1  ;;  %v2095_v0 = vadd.f32 %v2094_v63, %v2093_v61 }
 0x737   : > { %v2088_v1 = vadd.f32 %v2087_v21, %v2086_v62  ;;  %v2096_v2 = vrot.slane %v2095_v0, 1 }
 0x739   : > { %v2089_v3 = vmul.f32 0.5, %v2088_v1  ;;  %v2097_v4 = vadd.f32 %v2096_v2, %v2095_v0 }
 0x73b   : > { %v2098_v5 = vmul.f32 0.5, %v2097_v4  ;;  %v2099_v6 = vmul.f32 %v2089_v3, %v2089_v3  ;;  %v2101_v9 = vsub.f32 %v2077_v50, %v2089_v3 }
 0x73d   : > { %v2100_v7 = vsub.f32 %v2098_v5, %v2099_v6 }
 0x73f   : > { %v2102_v8 = vadd.f32 1e-05, %v2100_v7 }
 0x741   : > { %3131 = vrsqrt.f32 %v2102_v8 }
 0x74b   : > { %v3132_v10 = vpop.eup %3131 }
 0x74c   : > { %v2104_v12 = vmul.f32 %v3132_v10, %v2101_v9 }
 0x74e   : > { %v2112_v14 = vmul.f32 %v2656_v11, %v2104_v12 }
 0x750   : > { %v2120_v16 = vadd.f32 %v2657_v13, %v2112_v14 }
 0x752   : > { %v2121_v17 = vmax.f32 %v2120_v16, 0.0 }
 0x754   : > { %v2122_v18 = vpack.c.bf16 %v2121_v17, %v2121_v17 }
 0x756   : > { %2809 = vmatmul.mubr.bf16.vlgmr.msra.gmra.mrb[4].mxu0 %v2122_v18 }
 0x829   : > { %v2228_v20 = vpop.f32.mrb[4].mxu0 }
 0x82a   : > { %v2229_v22 = vadd.f32 %v2658_v19, %v2228_v20  ;;  %v2810_v23 = vpop.f32.mrb[5].mxu0 }
 0x82b   : > { %v2231_v24 = vpop.f32.mrb[6].mxu0 }
 0x82c   : > { %2234 = vst [vmem:[#allocation29] sm:$0x3] %v2229_v22  ;;  %v2811_v25 = vpop.f32.mrb[7].mxu0 }
 0x82d PF: > { %p2948_p12 = scmp.eq.s32.totalorder %s3853_s29, 1  ;;  %s3721_s9 = smov [#allocation29]  }
 0x82e   : > { %s2242_s3 = sshll.u32 %s3721_s9, 4  ;;  %s2243_s3 = int_to_ptr.vmem [resolvable:$true] %s2242_s3 }
 0x82f   : > { %s3593_s16 = scalar_lea.vmem %s2243_s3, 32  ;;  %p3600_p11 = scmp.lt.s32.totalorder %s2243_s3, %s2243_s3 }
 0x830   : > { %p3594_p9 = scmp.ne.s32.totalorder %s2243_s3, %s3593_s16  ;;  %p3601_p1 = scmp.lt.s32.totalorder %s3593_s16, %s3593_s16 }
 0x832   : > { %p3595_p3 = pnand %p3594_p9, %p2948_p12  ;;  %p3602_p4 = por %p3601_p1, %p3600_p11 }
 0x834   : > { %p3596_p0 = pneg %p3595_p3 }
 0x836   : > { %p3603_p2 = pnand %p3602_p4, %p3596_p0 }
 0x838   : > { %3606 = shalt.err (!%p3603_p2)
}
 0x839   : > { %s4739_s30 = sld [smem:[#allocation60_spill]] }
 0x83f   : > { %s3607_s12 = scalar_lea.hbm %s4739_s30, 32 }
 0x840   : > { %p3608_p6 = scmp.ne.s32.totalorder %s4739_s30, %s3607_s12  ;;  %p3613_p10 = scmp.lt.u32.totalorder %s3607_s12, %s4739_s30 }
 0x842   : > { %p3609_p13 = pnand %p3608_p6, %p2948_p12 }
 0x844   : > { %p3610_p5 = pneg %p3609_p13 }
 0x846   : > { %p3615_p7 = pnand %p3613_p10, %p3610_p5 }
 0x848   : > { %3618 = shalt.err (!%p3615_p7)
}
 0x849   : > { %2874 = dma.vmem_to_hbm [thread:$0]  (%p2948_p12), %s2243_s3, 32, %s4739_s30, [#allocation5]  }
 0x84a   : > { %3676 = dma.done.wait (%p2948_p12), [#allocation5], 32  }
 0x84b   : > { %3678 = vsyncadd (%p2948_p12), [#allocation5], 4294967264 }
 0x84c PF: > { %s4740_s27 = sld [smem:[#allocation43_spill]]  ;;  %s4741_s7 = sld [smem:[#allocation41_spill]] }
 0x84d   : > { %s4742_s26 = sld [smem:[#allocation44_spill]]  ;;  %s4743_s2 = smov %s3685_s25 }
 0x852   : > { %p46_p8 = scmp.ge.s32.totalorder %s4740_s27, 4   ;;  %s4744_s25 = smov %s4741_s7 }
 0x854   :  { %48 = sbr.rel (!%p46_p8) target bundleno = 32 (0x20), region = 256 }
 0x85b   :  { %2255 = vsyncpa [#allocation4], 1 }
 0x85c   :  { %2257 = vsyncpa [#allocation4 + $0x1], 1 }
 0x85d   :  { %2258 = vsyncpa [#allocation7], 1 }
 0x85e   :  { %2260 = vsyncpa [#allocation7 + $0x1], 1 }
 0x85f   :  { %2261 = vsyncpa [#allocation10], 1 }
 0x860   :  { %2263 = vsyncpa [#allocation10 + $0x1], 1 }
 0x861   :  { %2264 = vsyncpa [#allocation13], 1 }
 0x862   :  { %2266 = vsyncpa [#allocation13 + $0x1], 1 }
 0x863   :  { %2267 = vsyncpa [#allocation16], 1 }
 0x864   :  { %2268 = vsyncpa [#allocation19], 1 }
 0x865   :  { %2269 = vsyncpa [#allocation22], 1 }
 0x866   :  { %2270 = vsyncpa [#allocation25], 1 }
 0x867   :  { %2271 = vsyncpa [#allocation28], 1 }
 0x868   :  { %2272 = vsyncpa [#allocation5], 1 }
 0x869   :  { %2274 = vsyncpa [#allocation5 + $0x1], 1 }

</bundles_post_ra>
